<compile_context>
chip_gen: v5e
topology: v5e:2x2
jax: 0.10.0
libtpu: 0.0.40
codegen_flags: <defaults>
</compile_context>

<pallas_src>
import math
import jax
import jax.numpy as jnp
from jax.experimental import pallas as pl
from jax.experimental.pallas import tpu as pltpu

D_MODEL = 128      # feature_size (kept small but lane-dense)
FF_DIM = 256       # dim_feedforward of the encoder layer
EPS = 1e-5         # PyTorch layer_norm_eps default

# row indices inside the packed (7, D_MODEL) vector array
_B_INC, _B_ATTN, _G1, _BE1, _B2, _G2, _BE2 = range(7)


def _layernorm(h, gamma, beta):
    # single pass: two independent reductions (sum, sum-of-squares), all f32
    d = h.shape[-1]
    s = jnp.sum(h, axis=-1, keepdims=True)
    sq = jnp.sum(h * h, axis=-1, keepdims=True)
    mu = s * (1.0 / d)
    var = sq * (1.0 / d) - mu * mu
    return (h - mu) * jax.lax.rsqrt(var + EPS) * gamma + beta


def transam_kernel(x_ref, w_inc, w_vo, w1, w2, vec_ref, b1_ref, o_ref):
    def mm(a, w):
        # bf16 operands, f32 accumulation on the MXU
        return jnp.dot(a.astype(jnp.bfloat16), w[...],
                       preferred_element_type=jnp.float32)

    def vec(i):
        return vec_ref[i:i + 1, :]          # (1, D) f32, broadcasts over rows

    x = x_ref[...].astype(jnp.float32)

    # fused input_project(*sqrt(d_model)) + context_embedding Conv1d(k=1), then
    # tanh.  Kept in f32: the sqrt(d_model) scale is folded into w_inc, so a
    # bf16 matmul here would inject O(0.05) absolute error into the tanh
    # pre-activation (that was the previous version's failure).  K = F is tiny.
    h = jnp.tanh(jnp.dot(x, w_inc[...], preferred_element_type=jnp.float32)
                 + vec(_B_INC))

    # self-attention with seq_len == 1 (softmax == 1) + positional encoding +
    # residual:  (h+pe0) + out_proj(V(h+pe0))
    #            == h + h @ (W_v W_o) + [pe0 + pe0 @ (W_v W_o) + b_v W_o + b_o]
    # W_vo = W_v @ W_o is bf16; the skip connection itself stays f32.
    h = h + mm(h, w_vo) + vec(_B_ATTN)
    h = _layernorm(h, vec(_G1), vec(_BE1))

    # feed-forward block (ReLU) + residual + LayerNorm.
    # The (tm, FF) activation is the largest live intermediate: hold it in bf16.
    f = jnp.maximum(mm(h, w1) + b1_ref[...], 0.0).astype(jnp.bfloat16)
    h = h + jnp.dot(f, w2[...], preferred_element_type=jnp.float32) + vec(_B2)
    h = _layernorm(h, vec(_G2), vec(_BE2))

    o_ref[...] = h.astype(o_ref.dtype)


def _round_up(x, m):
    return (x + m - 1) // m * m


def transam_forward(x, fused, *, tm_max=1024, min_tiles=2,
                    out_dtype=jnp.float32):
    S, F = x.shape

    # Tile choice: at least `min_tiles` tiles so the "parallel" grid axis can
    # split across both v7x TensorCores, rows rounded to a multiple of 8
    # (sublane constraint), capped at tm_max, sized to minimize tail padding.
    # Per-step VMEM footprint at tm_max=1024 is ~2 MB + ~0.2 MB of resident
    # weights, far below the scoped limit on every generation.
    n_tiles = max(min_tiles, pl.cdiv(S, tm_max))
    tm = _round_up(pl.cdiv(S, n_tiles), 8)
    n_tiles = pl.cdiv(S, tm)
    s_pad = n_tiles * tm
    if s_pad != S:
        # pad the ragged row tail; padded rows produce finite garbage that is
        # sliced away below (rows are independent, layernorm eps keeps rsqrt
        # finite).
        x = jnp.pad(x, ((0, s_pad - S), (0, 0)))

    def full_spec(a):
        # whole-array block, replicated across the row grid
        return pl.BlockSpec(a.shape, lambda i: (0, 0))

    flops = 2 * s_pad * (F * D_MODEL + D_MODEL * D_MODEL
                         + 2 * D_MODEL * FF_DIM)
    transcendentals = s_pad * D_MODEL + 2 * s_pad      # tanh + 2 rsqrt per row
    bytes_accessed = (s_pad * F * 4
                      + s_pad * D_MODEL * jnp.dtype(out_dtype).itemsize
                      + sum(int(a.size) * a.dtype.itemsize for a in fused))

    out = pl.pallas_call(
        transam_kernel,
        out_shape=jax.ShapeDtypeStruct((s_pad, D_MODEL), out_dtype),
        grid=(n_tiles,),
        in_specs=[pl.BlockSpec((tm, F), lambda i: (i, 0))]
                 + [full_spec(a) for a in fused],
        out_specs=pl.BlockSpec((tm, D_MODEL), lambda i: (i, 0)),
        compiler_params=pltpu.CompilerParams(
            dimension_semantics=("parallel",)),
        cost_estimate=pl.CostEstimate(
            flops=int(flops),
            transcendentals=int(transcendentals),
            bytes_accessed=int(bytes_accessed)),
    )(x, *fused)
    return out[:S]


def init_params(key, feature_dim):
    """Raw (unfused) parameters, mirroring the PyTorch module's tensors."""
    D, FF = D_MODEL, FF_DIM
    ks = jax.random.split(key, 12)

    def w(k, shape, scale):
        return jax.random.normal(k, shape, jnp.float32) * scale

    w_in = w(ks[0], (feature_dim, D), 1.0 / math.sqrt(feature_dim))
    b_in = w(ks[1], (1, D), 0.02)
    w_c = w(ks[2], (D, D), 1.0 / math.sqrt(D))      # Conv1d weight [out,in,1] -> [in,out]
    b_c = w(ks[3], (1, D), 0.02)
    # sinusoidal PE at position 0: sin(0)=0 on even dims, cos(0)=1 on odd dims
    pe0 = jnp.tile(jnp.array([[0.0, 1.0]], jnp.float32), (1, D // 2))
    w_v = w(ks[4], (D, D), 1.0 / math.sqrt(D))
    b_v = w(ks[5], (1, D), 0.02)
    w_o = w(ks[6], (D, D), 1.0 / math.sqrt(D))
    b_o = w(ks[7], (1, D), 0.02)
    g1 = jnp.ones((1, D), jnp.float32)
    be1 = jnp.zeros((1, D), jnp.float32)
    w1 = w(ks[8], (D, FF), 1.0 / math.sqrt(D))
    b1 = w(ks[9], (1, FF), 0.02)
    w2 = w(ks[10], (FF, D), 1.0 / math.sqrt(FF))
    b2 = w(ks[11], (1, D), 0.02)
    g2 = jnp.ones((1, D), jnp.float32)
    be2 = jnp.zeros((1, D), jnp.float32)
    return [w_in, b_in, w_c, b_c, pe0, w_v, b_v, w_o, b_o,
            g1, be1, w1, b1, w2, b2, g2, be2]


def fuse_params(params):
    """Host-side parameter prep (all in f32):
      * fold sqrt(d_model) into the input projection and fuse it with the
        k=1 conv:  W_inC = (W_in*sqrt(d)) @ W_c,  b_inC = (b_in*sqrt(d)) @ W_c + b_c
        (exact: there is no nonlinearity between the two linears).
      * fuse the seq_len==1 attention V-proj/out-proj into W_vo = W_v @ W_o and
        fold pe0 + biases into one f32 bias; the residual stays explicit
        in-kernel so the skip connection is never quantized.
      * pack all per-feature vectors into one (7, D) f32 array.
      * cast the large matmul weights to bf16 (f32 MXU accumulation in-kernel);
        W_inC stays f32 (sqrt(d_model)-scaled, feeds a tanh)."""
    (w_in, b_in, w_c, b_c, pe0, w_v, b_v, w_o, b_o,
     g1, be1, w1, b1, w2, b2, g2, be2) = params
    scale = math.sqrt(D_MODEL)
    w_inc = (w_in * scale) @ w_c                       # (F, D) f32
    b_inc = (b_in * scale) @ w_c + b_c                 # (1, D) f32
    w_vo = w_v @ w_o                                   # (D, D)
    b_attn = pe0 + pe0 @ w_vo + b_v @ w_o + b_o        # (1, D) f32
    vecs = jnp.concatenate(
        [b_inc, b_attn, g1, be1, b2, g2, be2], axis=0)  # (7, D) f32
    bf = jnp.bfloat16
    return [w_inc.astype(jnp.float32), w_vo.astype(bf),
            w1.astype(bf), w2.astype(bf),
            vecs.astype(jnp.float32), b1.astype(jnp.float32)]


def reference_forward(x, params):
    """Pure-JAX f32 reference using the *unfused* parameters and the original
    (un-rewritten) math, so it also validates the host-side fusion."""
    (w_in, b_in, w_c, b_c, pe0, w_v, b_v, w_o, b_o,
     g1, be1, w1, b1, w2, b2, g2, be2) = params
    h = (x @ w_in + b_in) * math.sqrt(D_MODEL)
    h = jnp.tanh(h @ w_c + b_c)
    h = h + pe0
    attn = (h @ w_v + b_v) @ w_o + b_o
    h = h + attn
    mu = jnp.mean(h, -1, keepdims=True)
    var = jnp.mean((h - mu) ** 2, -1, keepdims=True)
    h = (h - mu) / jnp.sqrt(var + EPS) * g1 + be1
    f = jnp.maximum(h @ w1 + b1, 0.0) @ w2 + b2
    h = h + f
    mu = jnp.mean(h, -1, keepdims=True)
    var = jnp.mean((h - mu) ** 2, -1, keepdims=True)
    h = (h - mu) / jnp.sqrt(var + EPS) * g2 + be2
    return h


if __name__ == "__main__":
    S, F = 300, 4                    # rows (act as batch; non-multiple of 8), feature_dim
    key = jax.random.PRNGKey(0)
    k_x, k_p = jax.random.split(key)
    x = jax.random.normal(k_x, (S, F), jnp.float32)

    params = init_params(k_p, F)
    fused = fuse_params(params)

    # adaptive tiling -> two balanced 152-row tiles (4 padded rows total)
    out = transam_forward(x, fused)
    out = jax.block_until_ready(out)

    ref = reference_forward(x, params)
    assert out.shape == (S, D_MODEL)
    # bf16 matmul operands (f32 accumulation) vs an all-f32 reference; the
    # precision-critical first matmul / residual adds are kept in f32.
    max_err = float(jnp.max(jnp.abs(out - ref)))
    assert jnp.allclose(out, ref, rtol=5e-2, atol=5e-2), (
        "mismatch vs reference (max abs err %.4f)" % max_err)

    print("KERNEL_OK")
</pallas_src>

<mosaic_0001>
module attributes {stable_mosaic.version = 11 : i64} {
  func.func @transam_kernel(%arg0: i32, %arg1: memref<152x4xf32, #tpu.memory_space<vmem>>, %arg2: memref<4x128xf32, #tpu.memory_space<vmem>>, %arg3: memref<128x128xbf16, #tpu.memory_space<vmem>>, %arg4: memref<128x256xbf16, #tpu.memory_space<vmem>>, %arg5: memref<256x128xbf16, #tpu.memory_space<vmem>>, %arg6: memref<7x128xf32, #tpu.memory_space<vmem>>, %arg7: memref<1x256xf32, #tpu.memory_space<vmem>>, %arg8: memref<152x128xf32, #tpu.memory_space<vmem>>) attributes {dimension_semantics = [#tpu.dimension_semantics<parallel>], iteration_bounds = array<i64: 2>, scalar_prefetch = 0 : i64, scratch_operands = 0 : i64, tpu.core_type = #tpu.core_type<tc>, window_params = [{transform_indices = @transform_0, window_bounds = array<i64: 152, 4>}, {pipeline_mode = #tpu.pipeline_mode<synchronous>, transform_indices = @transform_1, window_bounds = array<i64: 4, 128>}, {pipeline_mode = #tpu.pipeline_mode<synchronous>, transform_indices = @transform_2, window_bounds = array<i64: 128, 128>}, {pipeline_mode = #tpu.pipeline_mode<synchronous>, transform_indices = @transform_3, window_bounds = array<i64: 128, 256>}, {pipeline_mode = #tpu.pipeline_mode<synchronous>, transform_indices = @transform_4, window_bounds = array<i64: 256, 128>}, {pipeline_mode = #tpu.pipeline_mode<synchronous>, transform_indices = @transform_5, window_bounds = array<i64: 7, 128>}, {pipeline_mode = #tpu.pipeline_mode<synchronous>, transform_indices = @transform_6, window_bounds = array<i64: 1, 256>}, {transform_indices = @transform_7, window_bounds = array<i64: 152, 128>}]} {
    %c0 = arith.constant 0 : index
    %c0_0 = arith.constant 0 : index
    %0 = vector.load %arg1[%c0, %c0_0] : memref<152x4xf32, #tpu.memory_space<vmem>>, vector<152x4xf32>
    %c0_1 = arith.constant 0 : index
    %c0_2 = arith.constant 0 : index
    %1 = vector.load %arg2[%c0_1, %c0_2] : memref<4x128xf32, #tpu.memory_space<vmem>>, vector<4x128xf32>
    %cst = arith.constant dense<0.000000e+00> : vector<152x128xf32>
    %2 = tpu.matmul %0, %1, %cst {dimension_numbers = #tpu.dot_dimension_numbers<[1], [0], [0], [1], [0, 0, 1, 1], [], []>} : vector<152x4xf32>, vector<4x128xf32>, vector<152x128xf32> -> vector<152x128xf32>
    %c0_3 = arith.constant 0 : index
    %c0_4 = arith.constant 0 : index
    %3 = vector.load %arg6[%c0_3, %c0_4] : memref<7x128xf32, #tpu.memory_space<vmem>>, vector<1x128xf32>
    %4 = vector.broadcast %3 : vector<1x128xf32> to vector<152x128xf32>
    %5 = arith.addf %2, %4 : vector<152x128xf32>
    %6 = math.tanh %5 : vector<152x128xf32>
    %7 = arith.truncf %6 : vector<152x128xf32> to vector<152x128xbf16>
    %c0_5 = arith.constant 0 : index
    %c0_6 = arith.constant 0 : index
    %8 = vector.load %arg3[%c0_5, %c0_6] : memref<128x128xbf16, #tpu.memory_space<vmem>>, vector<128x128xbf16>
    %cst_7 = arith.constant dense<0.000000e+00> : vector<152x128xf32>
    %9 = tpu.matmul %7, %8, %cst_7 {dimension_numbers = #tpu.dot_dimension_numbers<[1], [0], [0], [1], [0, 0, 1, 1], [], []>} : vector<152x128xbf16>, vector<128x128xbf16>, vector<152x128xf32> -> vector<152x128xf32>
    %10 = arith.addf %6, %9 : vector<152x128xf32>
    %c1 = arith.constant 1 : index
    %c0_8 = arith.constant 0 : index
    %11 = vector.load %arg6[%c1, %c0_8] : memref<7x128xf32, #tpu.memory_space<vmem>>, vector<1x128xf32>
    %12 = vector.broadcast %11 : vector<1x128xf32> to vector<152x128xf32>
    %13 = arith.addf %10, %12 : vector<152x128xf32>
    %c2 = arith.constant 2 : index
    %c0_9 = arith.constant 0 : index
    %14 = vector.load %arg6[%c2, %c0_9] : memref<7x128xf32, #tpu.memory_space<vmem>>, vector<1x128xf32>
    %c3 = arith.constant 3 : index
    %c0_10 = arith.constant 0 : index
    %15 = vector.load %arg6[%c3, %c0_10] : memref<7x128xf32, #tpu.memory_space<vmem>>, vector<1x128xf32>
    %cst_11 = arith.constant dense<0.000000e+00> : vector<152xf32>
    %16 = vector.multi_reduction <add>, %13, %cst_11 [1] : vector<152x128xf32> to vector<152xf32>
    %17 = vector.shape_cast %16 : vector<152xf32> to vector<152x1xf32>
    %18 = arith.mulf %13, %13 : vector<152x128xf32>
    %cst_12 = arith.constant dense<0.000000e+00> : vector<152xf32>
    %19 = vector.multi_reduction <add>, %18, %cst_12 [1] : vector<152x128xf32> to vector<152xf32>
    %20 = vector.shape_cast %19 : vector<152xf32> to vector<152x1xf32>
    %cst_13 = arith.constant 7.812500e-03 : f32
    %21 = vector.broadcast %cst_13 : f32 to vector<152x1xf32>
    %22 = arith.mulf %17, %21 : vector<152x1xf32>
    %cst_14 = arith.constant 7.812500e-03 : f32
    %23 = vector.broadcast %cst_14 : f32 to vector<152x1xf32>
    %24 = arith.mulf %20, %23 : vector<152x1xf32>
    %25 = arith.mulf %22, %22 : vector<152x1xf32>
    %26 = arith.subf %24, %25 : vector<152x1xf32>
    %27 = vector.broadcast %22 : vector<152x1xf32> to vector<152x128xf32>
    %28 = arith.subf %13, %27 : vector<152x128xf32>
    %cst_15 = arith.constant 9.99999974E-6 : f32
    %29 = vector.broadcast %cst_15 : f32 to vector<152x1xf32>
    %30 = arith.addf %26, %29 : vector<152x1xf32>
    %31 = math.rsqrt %30 : vector<152x1xf32>
    %32 = vector.broadcast %31 : vector<152x1xf32> to vector<152x128xf32>
    %33 = arith.mulf %28, %32 : vector<152x128xf32>
    %34 = vector.broadcast %14 : vector<1x128xf32> to vector<152x128xf32>
    %35 = arith.mulf %33, %34 : vector<152x128xf32>
    %36 = vector.broadcast %15 : vector<1x128xf32> to vector<152x128xf32>
    %37 = arith.addf %35, %36 : vector<152x128xf32>
    %38 = arith.truncf %37 : vector<152x128xf32> to vector<152x128xbf16>
    %c0_16 = arith.constant 0 : index
    %c0_17 = arith.constant 0 : index
    %39 = vector.load %arg4[%c0_16, %c0_17] : memref<128x256xbf16, #tpu.memory_space<vmem>>, vector<128x256xbf16>
    %cst_18 = arith.constant dense<0.000000e+00> : vector<152x256xf32>
    %40 = tpu.matmul %38, %39, %cst_18 {dimension_numbers = #tpu.dot_dimension_numbers<[1], [0], [0], [1], [0, 0, 1, 1], [], []>} : vector<152x128xbf16>, vector<128x256xbf16>, vector<152x256xf32> -> vector<152x256xf32>
    %c0_19 = arith.constant 0 : index
    %c0_20 = arith.constant 0 : index
    %41 = vector.load %arg7[%c0_19, %c0_20] : memref<1x256xf32, #tpu.memory_space<vmem>>, vector<1x256xf32>
    %42 = vector.broadcast %41 : vector<1x256xf32> to vector<152x256xf32>
    %43 = arith.addf %40, %42 : vector<152x256xf32>
    %cst_21 = arith.constant 0.000000e+00 : f32
    %44 = vector.broadcast %cst_21 : f32 to vector<152x256xf32>
    %45 = arith.maximumf %43, %44 : vector<152x256xf32>
    %46 = arith.truncf %45 : vector<152x256xf32> to vector<152x256xbf16>
    %c0_22 = arith.constant 0 : index
    %c0_23 = arith.constant 0 : index
    %47 = vector.load %arg5[%c0_22, %c0_23] : memref<256x128xbf16, #tpu.memory_space<vmem>>, vector<256x128xbf16>
    %cst_24 = arith.constant dense<0.000000e+00> : vector<152x128xf32>
    %48 = tpu.matmul %46, %47, %cst_24 {dimension_numbers = #tpu.dot_dimension_numbers<[1], [0], [0], [1], [0, 0, 1, 1], [], []>} : vector<152x256xbf16>, vector<256x128xbf16>, vector<152x128xf32> -> vector<152x128xf32>
    %49 = arith.addf %37, %48 : vector<152x128xf32>
    %c4 = arith.constant 4 : index
    %c0_25 = arith.constant 0 : index
    %50 = vector.load %arg6[%c4, %c0_25] : memref<7x128xf32, #tpu.memory_space<vmem>>, vector<1x128xf32>
    %51 = vector.broadcast %50 : vector<1x128xf32> to vector<152x128xf32>
    %52 = arith.addf %49, %51 : vector<152x128xf32>
    %c5 = arith.constant 5 : index
    %c0_26 = arith.constant 0 : index
    %53 = vector.load %arg6[%c5, %c0_26] : memref<7x128xf32, #tpu.memory_space<vmem>>, vector<1x128xf32>
    %c6 = arith.constant 6 : index
    %c0_27 = arith.constant 0 : index
    %54 = vector.load %arg6[%c6, %c0_27] : memref<7x128xf32, #tpu.memory_space<vmem>>, vector<1x128xf32>
    %cst_28 = arith.constant dense<0.000000e+00> : vector<152xf32>
    %55 = vector.multi_reduction <add>, %52, %cst_28 [1] : vector<152x128xf32> to vector<152xf32>
    %56 = vector.shape_cast %55 : vector<152xf32> to vector<152x1xf32>
    %57 = arith.mulf %52, %52 : vector<152x128xf32>
    %cst_29 = arith.constant dense<0.000000e+00> : vector<152xf32>
    %58 = vector.multi_reduction <add>, %57, %cst_29 [1] : vector<152x128xf32> to vector<152xf32>
    %59 = vector.shape_cast %58 : vector<152xf32> to vector<152x1xf32>
    %cst_30 = arith.constant 7.812500e-03 : f32
    %60 = vector.broadcast %cst_30 : f32 to vector<152x1xf32>
    %61 = arith.mulf %56, %60 : vector<152x1xf32>
    %cst_31 = arith.constant 7.812500e-03 : f32
    %62 = vector.broadcast %cst_31 : f32 to vector<152x1xf32>
    %63 = arith.mulf %59, %62 : vector<152x1xf32>
    %64 = arith.mulf %61, %61 : vector<152x1xf32>
    %65 = arith.subf %63, %64 : vector<152x1xf32>
    %66 = vector.broadcast %61 : vector<152x1xf32> to vector<152x128xf32>
    %67 = arith.subf %52, %66 : vector<152x128xf32>
    %cst_32 = arith.constant 9.99999974E-6 : f32
    %68 = vector.broadcast %cst_32 : f32 to vector<152x1xf32>
    %69 = arith.addf %65, %68 : vector<152x1xf32>
    %70 = math.rsqrt %69 : vector<152x1xf32>
    %71 = vector.broadcast %70 : vector<152x1xf32> to vector<152x128xf32>
    %72 = arith.mulf %67, %71 : vector<152x128xf32>
    %73 = vector.broadcast %53 : vector<1x128xf32> to vector<152x128xf32>
    %74 = arith.mulf %72, %73 : vector<152x128xf32>
    %75 = vector.broadcast %54 : vector<1x128xf32> to vector<152x128xf32>
    %76 = arith.addf %74, %75 : vector<152x128xf32>
    %c0_33 = arith.constant 0 : index
    %c0_34 = arith.constant 0 : index
    %77 = vector.load %arg8[%c0_33, %c0_34] : memref<152x128xf32, #tpu.memory_space<vmem>>, vector<152x128xf32>
    tpu.vector_store %arg8[%c0_33, %c0_34], %76 {strides = array<i32>} : memref<152x128xf32, #tpu.memory_space<vmem>>, vector<152x128xf32>,
    return
  }
  func.func @transform_0(%arg0: i32) -> (i32, i32) {
    %c0_i32 = arith.constant 0 : i32
    %c0_i32_0 = arith.constant 0 : i32
    return %arg0, %c0_i32 : i32, i32
  }
  func.func @transform_1(%arg0: i32) -> (i32, i32) {
    %c0_i32 = arith.constant 0 : i32
    %c0_i32_0 = arith.constant 0 : i32
    %c0_i32_1 = arith.constant 0 : i32
    return %c0_i32, %c0_i32_0 : i32, i32
  }
  func.func @transform_2(%arg0: i32) -> (i32, i32) {
    %c0_i32 = arith.constant 0 : i32
    %c0_i32_0 = arith.constant 0 : i32
    %c0_i32_1 = arith.constant 0 : i32
    return %c0_i32, %c0_i32_0 : i32, i32
  }
  func.func @transform_3(%arg0: i32) -> (i32, i32) {
    %c0_i32 = arith.constant 0 : i32
    %c0_i32_0 = arith.constant 0 : i32
    %c0_i32_1 = arith.constant 0 : i32
    return %c0_i32, %c0_i32_0 : i32, i32
  }
  func.func @transform_4(%arg0: i32) -> (i32, i32) {
    %c0_i32 = arith.constant 0 : i32
    %c0_i32_0 = arith.constant 0 : i32
    %c0_i32_1 = arith.constant 0 : i32
    return %c0_i32, %c0_i32_0 : i32, i32
  }
  func.func @transform_5(%arg0: i32) -> (i32, i32) {
    %c0_i32 = arith.constant 0 : i32
    %c0_i32_0 = arith.constant 0 : i32
    %c0_i32_1 = arith.constant 0 : i32
    return %c0_i32, %c0_i32_0 : i32, i32
  }
  func.func @transform_6(%arg0: i32) -> (i32, i32) {
    %c0_i32 = arith.constant 0 : i32
    %c0_i32_0 = arith.constant 0 : i32
    %c0_i32_1 = arith.constant 0 : i32
    return %c0_i32, %c0_i32_0 : i32, i32
  }
  func.func @transform_7(%arg0: i32) -> (i32, i32) {
    %c0_i32 = arith.constant 0 : i32
    %c0_i32_0 = arith.constant 0 : i32
    return %arg0, %c0_i32 : i32, i32
  }
}

</mosaic_0001>

<bundles_post_ra>
// kernel: tpu_custom_call.1
= control target key start
LH: loop header
LB: loop body
LE: loop exit
PB: predicated region body
PF: predicated region fallthrough
CT: control target
= control target key end

     0   :  { %12 = vsyncpa [#allocation3], 0  ;;  %s3944_s0 = inlined_call_operand.vmem [shape: f32[304,4], index: 0, kind: input, shape index: {}]   ;;  %s3945_s1 = inlined_call_operand.vmem [shape: f32[4,128], index: 1, kind: input, shape index: {}]   ;;  %s3946_s2 = inlined_call_operand.hbm [shape: bf16[128,128], index: 2, kind: input, shape index: {}]   ;;  %s3947_s3 = inlined_call_operand.vmem [shape: bf16[128,256], index: 3, kind: input, shape index: {}]   ;;  %s3948_s4 = inlined_call_operand.vmem [shape: bf16[256,128], index: 4, kind: input, shape index: {}]   ;;  %s3949_s5 = inlined_call_operand.vmem [shape: f32[7,128], index: 5, kind: input, shape index: {}]   ;;  %s3950_s6 = inlined_call_operand.vmem [shape: f32[1,256], index: 6, kind: input, shape index: {}]   ;;  %s3951_s7 = inlined_call_operand.hbm [shape: f32[304,128], index: 7, kind: output, shape index: {}]  }
   0x1   :  { %13 = vsyncpa [#allocation4], 0 }
   0x2   :  { %15 = vsyncpa [#allocation4 + $0x1], 0  ;;  %s2812_s24 = smov 0   ;;  %s2814_s25 = smov 0  }
   0x3   :  { %s2816_s26 = smov 0   ;;  %s2818_s27 = smov 0  }
   0x4 LB: > { %s2833_s28 = sadd.s32 4294967295, %s2765_s27   ;;  %s2245_s29 = sadd.s32 4294967294, %s2765_s27   ;;  %s2765_s27 = sphi %s2818_s27, %s3961_s27   ;;  %s2761_s26 = sphi %s2816_s26, %s3960_s26   ;;  %s2757_s25 = sphi %s2814_s25, %s3959_s25   ;;  %s2753_s24 = sphi %s2812_s24, %s3958_s24  }
   0x5   : > { %s2837_s30 = sadd.s32 1, %s2765_s27   ;;  %s180_s8 = sadd.s32 1, %s2761_s26 }
   0x6   : > { %s177_s9 = ssub.s32 %s2765_s27, %s2837_s30  ;;  %p190_p0 = scmp.ne.s32.totalorder %s2761_s26, %s2757_s25 }
   0x7   : > { %p178_p1 = scmp.eq.s32.totalorder %s177_s9, 0  ;;  %p191_p2 = scmp.eq.s32.totalorder %s2833_s28, 1 }
   0x8   : > { %p196_p3 = scmp.ne.s32.totalorder %s2757_s25, %s2753_s24  ;;  %p197_p4 = scmp.eq.s32.totalorder %s2245_s29, 1 }
   0x9   : > { %s2848_s10 = scalar_select %p178_p1, %s2761_s26, %s180_s8  }
   0xa   : > { %p2850_p5 = por %p191_p2, %p190_p0  ;;  %p2854_p6 = por %p197_p4, %p196_p3 }
   0xb   : > { %p2246_p7 = scmp.ge.s32.totalorder %s2765_s27, 1  ;;  %p204_p8 = scmp.lt.s32.totalorder %s2765_s27, 3 }
   0xc   : > { %p2508_p9 = scmp.eq.s32.totalorder %s2833_s28, 0  ;;  %s218_s15 = sshll.u32 %s3946_s2, 4  ;;  %s219_s15 = int_to_ptr.hbm [resolvable:$true] %s218_s15 }
   0xd   : > { %p205_p10 = pnand %p2246_p7, %p204_p8  ;;  %s2767_s16 = smov [#allocation2]  }
   0xe   : > { %s220_s17 = sshll.u32 %s2767_s16, 4  ;;  %s2768_s18 = smov 64   ;;  %s221_s17 = int_to_ptr.vmem [resolvable:$true] %s220_s17 }
   0xf   : > { %p2500_p11 = pneg %p205_p10  ;;  %s2769_s19 = smov 4  }
  0x10   : > { %257 = sbr.rel (%p205_p10) target bundleno = 1049 (0x419), region = 48 }
  0x11   : > { %p2501_p12 = pnand %p2508_p9, %p2500_p11 }
  0x13   : > { %2503 = dma.hbm_to_vmem [thread:$0]  (!%p2501_p12), %s219_s15, 1024, %s221_s17, [#allocation3], %s2768_s18, %s2768_s18, %s2769_s19  }
  0x15   : > { %2744 = dma.done.wait (%p2508_p9), [#allocation3], 1024  }
  0x16   : > { %2746 = vsyncadd (%p2508_p9), [#allocation3], 4294966272  ;;  %s290_s20 = smul.u32 19, %s2833_s28  ;;  %vm377_vm0 = vcmask 1043456   ;;  %vm319_vm1 = vcmask 31744   ;;  %v2442_v11 = vld [vmem:[#allocation2 + $0x38] sm:$0xff] }
  0x17   : > { %v316_v0 = vld [vmem:[%s3945_s1] sm:$0xf]  ;;  %548 = vmatpush.bf16.msra.mxu1 %v2442_v11  ;;  %v2441_v12 = vld [vmem:[#allocation2 + $0x30] sm:$0xff]  ;;  %2477 = vmatpush.bf16.msra.mxu2 %v2442_v11  ;;  %v2440_v15 = vld [vmem:[#allocation2 + $0x28] sm:$0xff]  ;;  %s287_s23 = sand.u32 1, %s2757_s25   ;;  %s2475_s16 = smul.u32 152, %s2833_s28 }
  0x18   : > { %p291_p13 = scmp.lt.s32.totalorder %s290_s20, 37  ;;  %2252 = vmatpush.msk.msra.mxu0 %vm377_vm0, %v316_v0  ;;  %2476 = vmatpush.msk.msra.mxu3 %vm377_vm0, %v316_v0  ;;  %v2439_v22 = vld [vmem:[#allocation2 + $0x20] sm:$0xff]  ;;  %v2438_v23 = vld [vmem:[#allocation2 + $0x18] sm:$0xff]  ;;  %v2437_v24 = vld [vmem:[#allocation2 + $0x10] sm:$0xff]  ;;  %s2719_s13 = scalar_lea.hbm %s3951_s7, 304 }
  0x19   : > { %v2436_v25 = vld [vmem:[#allocation2 + $0x8] sm:$0xff]  ;;  %v2435_v26 = vld [vmem:[#allocation2] sm:$0xff]  ;;  %s2167_s28 = scalar_lea.hbm %s3951_s7, %s2475_s16 }
  0x1a   : > { %s3963_s20 = smov (!%p291_p13, %s290_s20), 37  ;;  %v2920_v29 = vld [vmem:[%s3949_s5] ss:$0 sm:$0xff] }
  0x1b   : > { %s2251_s21 = sshll.u32 %s3963_s20, 3  ;;  %549 = vmatpush.bf16.msra.mxu1 %v2441_v12  ;;  %2478 = vmatpush.bf16.msra.mxu2 %v2441_v12  ;;  %s2170_s20 = sshll.u32 %s2167_s28, 4  ;;  %s2171_s20 = int_to_ptr.hbm [resolvable:$true] %s2170_s20 }
  0x1c   : > { %s2877_s9 = scalar_lea.vmem %s3944_s0, %s2251_s21  ;;  %s2156_s21 = scalar_lea.sflag [#allocation4], %s287_s23 }
  0x1d   : > { %v297_v1 = vld [vmem:[%s2877_s9] sm:$0xff]  ;;  %v298_v2 = vld [vmem:[%s2877_s9 + $0x8] sm:$0xff]  ;;  %v299_v3 = vld [vmem:[%s2877_s9 + $0x10] sm:$0xff]  ;;  %s2713_s22 = sshra.s32 %s2171_s20, 4  ;;  %s2714_s22 = int_to_ptr.hbm [resolvable:$true] %s2713_s22 }
  0x1e   : > { %2253 = vmatmul.msk.f32.vlgmr.msra.gmra.mxu0 %vm319_vm1, %v297_v1  ;;  %v300_v4 = vld [vmem:[%s2877_s9 + $0x18] sm:$0xff]  ;;  %v301_v5 = vld [vmem:[%s2877_s9 + $0x20] sm:$0xff]  ;;  %v302_v6 = vld [vmem:[%s2877_s9 + $0x28] sm:$0xff]  ;;  %s2715_s29 = scalar_lea.hbm %s2714_s22, 152  ;;  %p2720_p3 = scmp.lt.s32.totalorder %s2714_s22, %s3951_s7 }
  0x1f   : > { %v303_v7 = vld [vmem:[%s2877_s9 + $0x30] sm:$0xff]  ;;  %v309_v8 = vld [vmem:[%s2877_s9 + $0x60] sm:$0xff]  ;;  %v304_v9 = vld [vmem:[%s2877_s9 + $0x38] sm:$0xff]  ;;  %550 = vmatpush.bf16.msra.mxu1 %v2440_v15  ;;  %2479 = vmatpush.bf16.msra.mxu2 %v2440_v15  ;;  %p2716_p0 = scmp.ne.s32.totalorder %s2714_s22, %s2715_s29  ;;  %p2721_p4 = scmp.lt.s32.totalorder %s2719_s13, %s2715_s29 }
  0x20   : > { %2265 = vmatmul.msk.f32.vlgmr.msra.gmra.mxu3 %vm319_vm1, %v309_v8  ;;  %v310_v10 = vld [vmem:[%s2877_s9 + $0x68] sm:$0xff]  ;;  %v305_v13 = vld [vmem:[%s2877_s9 + $0x40] sm:$0xff]  ;;  %v311_v14 = vld [vmem:[%s2877_s9 + $0x70] sm:$0xff] }
  0x21   : > { %v306_v16 = vld [vmem:[%s2877_s9 + $0x48] sm:$0xff]  ;;  %v312_v17 = vld [vmem:[%s2877_s9 + $0x78] sm:$0xff]  ;;  %v307_v18 = vld [vmem:[%s2877_s9 + $0x50] sm:$0xff]  ;;  %p2717_p1 = pnand %p2716_p0, %p2850_p5  ;;  %p2722_p7 = por %p2721_p4, %p2720_p3 }
  0x22   : > { %v313_v19 = vld [vmem:[%s2877_s9 + $0x80] sm:$0xff]  ;;  %v308_v20 = vld [vmem:[%s2877_s9 + $0x58] sm:$0xff]  ;;  %v314_v21 = vld [vmem:[%s2877_s9 + $0x88] sm:$0xff] }
  0x23   : > { %551 = vmatpush.bf16.msra.mxu1 %v2439_v22  ;;  %2480 = vmatpush.bf16.msra.mxu2 %v2439_v22  ;;  %v315_v27 = vld [vmem:[%s2877_s9 + $0x90] sm:$0xff]  ;;  %s2493_s9 = smul.u32 152, %s287_s23  ;;  %p2718_p2 = pneg %p2717_p1 }
  0x25   : > { %s3763_s15 = scalar_lea.vmem [#allocation5], %s2493_s9  ;;  %p2723_p8 = pnand %p2722_p7, %p2718_p2 }
  0x26   : > { %2254 = vmatmul.msk.f32.gmra.mxu0 %vm319_vm1, %v298_v2  ;;  %s2168_s19 = sshll.u32 %s3763_s15, 4  ;;  %s2169_s19 = int_to_ptr.vmem [resolvable:$true] %s2168_s19 }
  0x27   : > { %552 = vmatpush.bf16.msra.mxu1 %v2438_v23  ;;  %2481 = vmatpush.bf16.msra.mxu2 %v2438_v23 }
  0x28   : > { %2266 = vmatmul.msk.f32.gmra.mxu3 %vm319_vm1, %v310_v10 }
  0x2b   : > { %553 = vmatpush.bf16.msra.mxu1 %v2437_v24  ;;  %2482 = vmatpush.bf16.msra.mxu2 %v2437_v24 }
  0x2e   : > { %2255 = vmatmul.msk.f32.gmra.mxu0 %vm319_vm1, %v299_v3 }
  0x2f   : > { %554 = vmatpush.bf16.msra.mxu1 %v2436_v25  ;;  %2483 = vmatpush.bf16.msra.mxu2 %v2436_v25 }
  0x30   : > { %2267 = vmatmul.msk.f32.gmra.mxu3 %vm319_vm1, %v311_v14 }
  0x33   : > { %555 = vmatpush.bf16.msra.mxu1 %v2435_v26  ;;  %2484 = vmatpush.bf16.msra.mxu2 %v2435_v26 }
  0x36   : > { %2256 = vmatmul.msk.f32.gmra.mxu0 %vm319_vm1, %v300_v4 }
  0x38   : > { %2268 = vmatmul.msk.f32.gmra.mxu3 %vm319_vm1, %v312_v17 }
  0x3e   : > { %2257 = vmatmul.msk.f32.gmra.mxu0 %vm319_vm1, %v301_v5 }
  0x40   : > { %2269 = vmatmul.msk.f32.gmra.mxu3 %vm319_vm1, %v313_v19 }
  0x46   : > { %2258 = vmatmul.msk.f32.gmra.mxu0 %vm319_vm1, %v302_v6 }
  0x48   : > { %2270 = vmatmul.msk.f32.gmra.mxu3 %vm319_vm1, %v314_v21 }
  0x4e   : > { %2259 = vmatmul.msk.f32.gmra.mxu0 %vm319_vm1, %v303_v7 }
  0x50   : > { %2271 = vmatmul.msk.f32.gmra.mxu3 %vm319_vm1, %v315_v27  ;;  %v2995_v27 = vld [vmem:[%s3949_s5 + $0x1] ss:$0 sm:$0xff] }
  0x56   : > { %2260 = vmatmul.msk.f32.gmra.mxu0 %vm319_vm1, %v304_v9 }
  0x5e   : > { %2261 = vmatmul.msk.f32.gmra.mxu0 %vm319_vm1, %v305_v13 }
  0x66   : > { %2262 = vmatmul.msk.f32.gmra.mxu0 %vm319_vm1, %v306_v16 }
  0x6e   : > { %2263 = vmatmul.msk.f32.gmra.mxu0 %vm319_vm1, %v307_v18 }
  0x76   : > { %2264 = vmatmul.msk.f32.gmra.mxu0 %vm319_vm1, %v308_v20 }
  0x9b   : > { %v398_v28 = vpop.f32.mrf.mxu0 }
  0x9c   : > { %v399_v30 = vadd.f32 %v2920_v29, %v398_v28 }
  0x9e   : > { %2555 = vtanh.f32 %v399_v30 }
  0xa3   : > { %v401_v31 = vpop.f32.mrf.mxu0  ;;  %v434_v63 = vpop.f32.mrf.mxu3 }
  0xa4   : > { %v402_v32 = vadd.f32 %v2920_v29, %v401_v31  ;;  %v2924_v33 = vpop.eup %2555  ;;  %v435_v9 = vadd.f32 %v2920_v29, %v434_v63 }
  0xa6   : > { %2557 = vtanh.f32 %v402_v32 }
  0xab   : > { %v404_v34 = vpop.f32.mrf.mxu0  ;;  %v437_v5 = vpop.f32.mrf.mxu3 }
  0xac   : > { %v2926_v35 = vpop.eup %2557  ;;  %v405_v37 = vadd.f32 %v2920_v29, %v404_v34  ;;  %v438_v11 = vadd.f32 %v2920_v29, %v437_v5 }
  0xad   : > { %v474_v36 = vpack.c.bf16 %v2926_v35, %v2924_v33 }
  0xae   : > { %2559 = vtanh.f32 %v405_v37 }
  0xaf   : > { %556 = vmatmul.bf16.vlgmr.msra.gmra.mxu1 %v474_v36 }
  0xb3   : > { %v407_v38 = vpop.f32.mrf.mxu0  ;;  %v440_v10 = vpop.f32.mrf.mxu3 }
  0xb4   : > { %v408_v39 = vadd.f32 %v2920_v29, %v407_v38  ;;  %v2932_v40 = vpop.eup %2559  ;;  %v441_v16 = vadd.f32 %v2920_v29, %v440_v10  ;;  %v2354_v10 = vld [vmem:[%s3947_s3 + $0x60] sm:$0xf] }
  0xb6   : > { %2561 = vtanh.f32 %v408_v39 }
  0xbb   : > { %v410_v41 = vpop.f32.mrf.mxu0  ;;  %v443_v13 = vpop.f32.mrf.mxu3 }
  0xbc   : > { %v2934_v42 = vpop.eup %2561  ;;  %v411_v44 = vadd.f32 %v2920_v29, %v410_v41  ;;  %v444_v17 = vadd.f32 %v2920_v29, %v443_v13 }
  0xbd   : > { %v475_v43 = vpack.c.bf16 %v2934_v42, %v2932_v40 }
  0xbe   : > { %2563 = vtanh.f32 %v411_v44 }
  0xbf   : > { %561 = vmatmul.bf16.gmra.mxu1 %v475_v43 }
  0xc3   : > { %v413_v45 = vpop.f32.mrf.mxu0  ;;  %v446_v18 = vpop.f32.mrf.mxu3 }
  0xc4   : > { %v414_v46 = vadd.f32 %v2920_v29, %v413_v45  ;;  %v2940_v47 = vpop.eup %2563  ;;  %v447_v23 = vadd.f32 %v2920_v29, %v446_v18 }
  0xc6   : > { %2565 = vtanh.f32 %v414_v46 }
  0xcb   : > { %v416_v48 = vpop.f32.mrf.mxu0  ;;  %v449_v21 = vpop.f32.mrf.mxu3 }
  0xcc   : > { %v2942_v49 = vpop.eup %2565  ;;  %v417_v51 = vadd.f32 %v2920_v29, %v416_v48  ;;  %v450_v24 = vadd.f32 %v2920_v29, %v449_v21  ;;  %v2346_v21 = vld [vmem:[%s3947_s3 + $0x50] sm:$0xf] }
  0xcd   : > { %v476_v50 = vpack.c.bf16 %v2942_v49, %v2940_v47 }
  0xce   : > { %2567 = vtanh.f32 %v417_v51 }
  0xcf   : > { %566 = vmatmul.bf16.gmra.mxu1 %v476_v50 }
  0xd3   : > { %v419_v52 = vpop.f32.mrf.mxu0  ;;  %v452_v28 = vpop.f32.mrf.mxu3 }
  0xd4   : > { %v420_v53 = vadd.f32 %v2920_v29, %v419_v52  ;;  %v2948_v54 = vpop.eup %2567  ;;  %v453_v34 = vadd.f32 %v2920_v29, %v452_v28  ;;  %v2364_v28 = vld [vmem:[%s3947_s3 + $0x78] sm:$0xf0] }
  0xd6   : > { %2569 = vtanh.f32 %v420_v53 }
  0xdb   : > { %v422_v55 = vpop.f32.mrf.mxu0 }
  0xdc   : > { %v2950_v56 = vpop.eup %2569  ;;  %v423_v58 = vadd.f32 %v2920_v29, %v422_v55 }
  0xdd   : > { %v477_v57 = vpack.c.bf16 %v2950_v56, %v2948_v54 }
  0xde   : > { %2571 = vtanh.f32 %v423_v58 }
  0xdf   : > { %571 = vmatmul.bf16.gmra.mxu1 %v477_v57 }
  0xe3   : > { %v425_v59 = vpop.f32.mrf.mxu0 }
  0xe4   : > { %v426_v60 = vadd.f32 %v2920_v29, %v425_v59  ;;  %v2956_v61 = vpop.eup %2571 }
  0xe6   : > { %2573 = vtanh.f32 %v426_v60 }
  0xeb   : > { %v428_v62 = vpop.f32.mrf.mxu0 }
  0xec   : > { %v2958_v0 = vpop.eup %2573  ;;  %v429_v2 = vadd.f32 %v2920_v29, %v428_v62 }
  0xed   : > { %v478_v1 = vpack.c.bf16 %v2958_v0, %v2956_v61 }
  0xee   : > { %2575 = vtanh.f32 %v429_v2 }
  0xef   : > { %576 = vmatmul.bf16.gmra.mxu1 %v478_v1 }
  0xf3   : > { %v431_v3 = vpop.f32.mrf.mxu0 }
  0xf4   : > { %v432_v4 = vadd.f32 %v2920_v29, %v431_v3  ;;  %v2964_v6 = vpop.eup %2575  ;;  %v2362_v3 = vld [vmem:[%s3947_s3 + $0x70] sm:$0xf] }
  0xf6   : > { %2577 = vtanh.f32 %v432_v4 }
  0xf7   : > { %2579 = vtanh.f32 %v435_v9 }
  0xf8   : > { %2581 = vtanh.f32 %v438_v11  ;;  %v2456_v11 = vld [vmem:[%s3947_s3 + $0x64] sm:$0xf0] }
  0xf9   : > { %2583 = vtanh.f32 %v441_v16  ;;  %v2355_v13 = vor.u32 %v2456_v11, %v2354_v10  ;;  %v2448_v10 = vld [vmem:[%s3947_s3 + $0x24] sm:$0xf0]  ;;  %v2447_v11 = vld [vmem:[%s3947_s3 + $0x24] sm:$0xf] }
  0xfa   : > { %2585 = vtanh.f32 %v444_v17 }
  0xfb   : > { %2587 = vtanh.f32 %v447_v23 }
  0xfc   : > { %v2966_v7 = vpop.eup %2577  ;;  %2589 = vtanh.f32 %v450_v24 }
  0xfd   : > { %v479_v8 = vpack.c.bf16 %v2966_v7, %v2964_v6  ;;  %v2972_v12 = vpop.eup %2579  ;;  %2591 = vtanh.f32 %v453_v34 }
  0xfe   : > { %v2974_v14 = vpop.eup %2581 }
  0xff   : > { %581 = vmatmul.bf16.vlgmr.msra.gmra.mxu2 %v479_v8  ;;  %v480_v15 = vpack.c.bf16 %v2974_v14, %v2972_v12  ;;  %v2980_v19 = vpop.eup %2583 }
 0x100   : > { %v2982_v20 = vpop.eup %2585 }
 0x101   : > { %v481_v22 = vpack.c.bf16 %v2982_v20, %v2980_v19  ;;  %v2988_v25 = vpop.eup %2587 }
 0x102   : > { %v2990_v26 = vpop.eup %2589 }
 0x103   : > { %v482_v32 = vpack.c.bf16 %v2990_v26, %v2988_v25  ;;  %v3011_v41 = vpop.eup %2591 }
 0x104   : > { %v483_v43 = vpack.c.bf16 %v3011_v41, %v3011_v41 }
 0x10f   : > { %586 = vmatmul.bf16.gmra.mxu2 %v480_v15 }
 0x11f   : > { %591 = vmatmul.bf16.gmra.mxu2 %v481_v22  ;;  %v2454_v22 = vld [vmem:[%s3947_s3 + $0x54] sm:$0xf0] }
 0x120   : > { %v2347_v23 = vor.u32 %v2454_v22, %v2346_v21 }
 0x12c   : > { %v557_v30 = vpop.f32.mrf.mxu1 }
 0x12d   : > { %v606_v31 = vadd.f32 %v2924_v33, %v557_v30 }
 0x12f   : > { %v3002_v36 = vadd.f32 %v2995_v27, %v606_v31  ;;  %596 = vmatmul.bf16.gmra.mxu2 %v482_v32 }
 0x131   : > { %648 = vadd.xlane.f32.xlu0 %v3002_v36  ;;  %v686_v37 = vmul.f32 %v3002_v36, %v3002_v36 }
 0x133   : > { %705 = vadd.xlane.f32.xlu1 %v686_v37  ;;  %v2338_v37 = vld [vmem:[%s3947_s3 + $0x40] sm:$0xf] }
 0x134   : > { %v559_v38 = vpop.f32.mrf.mxu1 }
 0x135   : > { %v607_v39 = vadd.f32 %v2926_v35, %v559_v38  ;;  %v2452_v38 = vld [vmem:[%s3947_s3 + $0x44] sm:$0xf0] }
 0x137   : > { %v3009_v33 = vadd.f32 %v2995_v27, %v607_v39  ;;  %v2339_v39 = vor.u32 %v2452_v38, %v2338_v37 }
 0x139   : > { %650 = vadd.xlane.f32.xlu0 %v3009_v33  ;;  %v687_v29 = vmul.f32 %v3009_v33, %v3009_v33 }
 0x13b   : > { %707 = vadd.xlane.f32.xlu1 %v687_v29 }
 0x13c   : > { %v562_v44 = vpop.f32.mrf.mxu1 }
 0x13d   : > { %v608_v45 = vadd.f32 %v2932_v40, %v562_v44 }
 0x13f   : > { %v3020_v46 = vadd.f32 %v2995_v27, %v608_v45  ;;  %601 = vmatmul.bf16.gmra.mxu2 %v483_v43  ;;  %v2356_v43 = vld [vmem:[%s3947_s3 + $0x68] sm:$0xf0] }
 0x141   : > { %652 = vadd.xlane.f32.xlu2 %v3020_v46  ;;  %v688_v35 = vmul.f32 %v3020_v46, %v3020_v46 }
 0x143   : > { %709 = vadd.xlane.f32.xlu0 %v688_v35 }
 0x144   : > { %v564_v48 = vpop.f32.mrf.mxu1 }
 0x145   : > { %v609_v50 = vadd.f32 %v2934_v42, %v564_v48 }
 0x147   : > { %v3027_v51 = vadd.f32 %v2995_v27, %v609_v50 }
 0x149   : > { %654 = vadd.xlane.f32.xlu2 %v3027_v51  ;;  %v689_v40 = vmul.f32 %v3027_v51, %v3027_v51 }
 0x14b   : > { %711 = vadd.xlane.f32.xlu1 %v689_v40 }
 0x14c   : > { %v567_v52 = vpop.f32.mrf.mxu1 }
 0x14d   : > { %v610_v53 = vadd.f32 %v2940_v47, %v567_v52 }
 0x14f   : > { %v3034_v55 = vadd.f32 %v2995_v27, %v610_v53 }
 0x151   : > { %656 = vadd.xlane.f32.xlu2 %v3034_v55  ;;  %v690_v42 = vmul.f32 %v3034_v55, %v3034_v55 }
 0x153   : > { %713 = vadd.xlane.f32.xlu1 %v690_v42  ;;  %v2453_v42 = vld [vmem:[%s3947_s3 + $0x54] sm:$0xf] }
 0x154   : > { %v569_v57 = vpop.f32.mrf.mxu1 }
 0x155   : > { %v611_v58 = vadd.f32 %v2942_v49, %v569_v57 }
 0x157   : > { %v3041_v59 = vadd.f32 %v2995_v27, %v611_v58 }
 0x159   : > { %658 = vadd.xlane.f32.xlu0 %v3041_v59  ;;  %v691_v47 = vmul.f32 %v3041_v59, %v3041_v59 }
 0x15b   : > { %715 = vadd.xlane.f32.xlu2 %v691_v47  ;;  %v2340_v47 = vld [vmem:[%s3947_s3 + $0x48] sm:$0xf0] }
 0x15c   : > { %v572_v60 = vpop.f32.mrf.mxu1 }
 0x15d   : > { %v612_v62 = vadd.f32 %v2948_v54, %v572_v60  ;;  %v2458_v54 = vld [vmem:[%s3947_s3 + $0x74] sm:$0xf0] }
 0x15e   : > { %v2363_v4 = vor.u32 %v2458_v54, %v2362_v3  ;;  %v2450_v3 = vld [vmem:[%s3947_s3 + $0x34] sm:$0xf0]  ;;  %v2449_v54 = vld [vmem:[%s3947_s3 + $0x34] sm:$0xf] }
 0x15f   : > { %v3048_v63 = vadd.f32 %v2995_v27, %v612_v62 }
 0x160   : > { %1218 = vmatpush.bf16.msrb.mxu2 %v2363_v4 }
 0x161   : > { %660 = vadd.xlane.f32.xlu0 %v3048_v63  ;;  %v692_v49 = vmul.f32 %v3048_v63, %v3048_v63 }
 0x163   : > { %717 = vadd.xlane.f32.xlu2 %v692_v49 }
 0x164   : > { %v574_v1 = vpop.f32.mrf.mxu1  ;;  %1219 = vmatpush.bf16.msrb.mxu2 %v2355_v13 }
 0x165   : > { %v613_v2 = vadd.f32 %v2950_v56, %v574_v1 }
 0x167   : > { %v3061_v5 = vadd.f32 %v2995_v27, %v613_v2  ;;  %v2330_v2 = vld [vmem:[%s3947_s3 + $0x30] sm:$0xf] }
 0x168   : > { %1220 = vmatpush.bf16.msrb.mxu2 %v2347_v23  ;;  %v2331_v4 = vor.u32 %v2450_v3, %v2330_v2 }
 0x169   : > { %662 = vadd.xlane.f32.xlu1 %v3061_v5  ;;  %v693_v8 = vmul.f32 %v3061_v5, %v3061_v5 }
 0x16b   : > { %719 = vadd.xlane.f32.xlu0 %v693_v8 }
 0x16c   : > { %v577_v56 = vpop.f32.mrf.mxu1  ;;  %1221 = vmatpush.bf16.msrb.mxu2 %v2339_v39 }
 0x16d   : > { %v614_v9 = vadd.f32 %v2956_v61, %v577_v56 }
 0x16f   : > { %v3074_v15 = vadd.f32 %v2995_v27, %v614_v9  ;;  %v2322_v9 = vld [vmem:[%s3947_s3 + $0x20] sm:$0xf] }
 0x170   : > { %1222 = vmatpush.bf16.msrb.mxu2 %v2331_v4 }
 0x171   : > { %664 = vadd.xlane.f32.xlu1 %v3074_v15  ;;  %v694_v16 = vmul.f32 %v3074_v15, %v3074_v15 }
 0x173   : > { %721 = vadd.xlane.f32.xlu0 %v694_v16  ;;  %v2323_v16 = vor.u32 %v2448_v10, %v2322_v9 }
 0x174   : > { %v579_v61 = vpop.f32.mrf.mxu1 }
 0x175   : > { %v615_v17 = vadd.f32 %v2958_v0, %v579_v61  ;;  %v2457_v0 = vld [vmem:[%s3947_s3 + $0x74] sm:$0xf]  ;;  %v2324_v61 = vld [vmem:[%s3947_s3 + $0x28] sm:$0xf0]  ;;  %1223 = vmatpush.bf16.msrb.mxu2 %v2323_v16 }
 0x176   : > { %v2367_v30 = vor.u32 %v2457_v0, %v2364_v28  ;;  %v2327_v21 = vor.u32 %v2447_v11, %v2324_v61  ;;  %v2314_v0 = vld [vmem:[%s3947_s3 + $0x10] sm:$0xf]  ;;  %v2446_v28 = vld [vmem:[%s3947_s3 + $0x14] sm:$0xf0] }
 0x177   : > { %v3081_v18 = vadd.f32 %v2995_v27, %v615_v17 }
 0x178   : > { %1276 = vmatpush.bf16.msrb.mxu3 %v2367_v30 }
 0x179   : > { %666 = vadd.xlane.f32.xlu2 %v3081_v18  ;;  %v695_v24 = vmul.f32 %v3081_v18, %v3081_v18 }
 0x17b   : > { %723 = vadd.xlane.f32.xlu1 %v695_v24 }
 0x182   : > { %v582_v31 = vpop.f32.mrf.mxu2 }
 0x183   : > { %v616_v32 = vadd.f32 %v2964_v6, %v582_v31  ;;  %v2455_v6 = vld [vmem:[%s3947_s3 + $0x64] sm:$0xf]  ;;  %v2315_v31 = vor.u32 %v2446_v28, %v2314_v0 }
 0x184   : > { %v2359_v44 = vor.u32 %v2455_v6, %v2356_v43  ;;  %v2306_v43 = vld [vmem:[%s3947_s3] sm:$0xf] }
 0x185   : > { %v3100_v34 = vadd.f32 %v2995_v27, %v616_v32  ;;  %v2316_v32 = vld [vmem:[%s3947_s3 + $0x18] sm:$0xf0]  ;;  %1224 = vmatpush.bf16.msrb.mxu2 %v2315_v31 }
 0x186   : > { %1277 = vmatpush.bf16.msrb.mxu3 %v2359_v44  ;;  %v2444_v44 = vld [vmem:[%s3947_s3 + $0x4] sm:$0xf0] }
 0x187   : > { %668 = vadd.xlane.f32.xlu2 %v3100_v34  ;;  %v696_v29 = vmul.f32 %v3100_v34, %v3100_v34 }
 0x189   : > { %725 = vadd.xlane.f32.xlu1 %v696_v29 }
 0x18a   : > { %v584_v45 = vpop.f32.mrf.mxu2 }
 0x18b   : > { %v617_v35 = vadd.f32 %v2966_v7, %v584_v45  ;;  %v2348_v7 = vld [vmem:[%s3947_s3 + $0x58] sm:$0xf0]  ;;  %v2443_v45 = vld [vmem:[%s3947_s3 + $0x4] sm:$0xf] }
 0x18c   : > { %v2351_v57 = vor.u32 %v2453_v42, %v2348_v7 }
 0x18d   : > { %v3119_v48 = vadd.f32 %v2995_v27, %v617_v35 }
 0x18e   : > { %1278 = vmatpush.bf16.msrb.mxu3 %v2351_v57 }
 0x18f   : > { %670 = vadd.xlane.f32.xlu0 %v3119_v48  ;;  %v697_v50 = vmul.f32 %v3119_v48, %v3119_v48 }
 0x191   : > { %727 = vadd.xlane.f32.xlu2 %v697_v50  ;;  %v2307_v50 = vor.u32 %v2444_v44, %v2306_v43 }
 0x192   : > { %v587_v40 = vpop.f32.mrf.mxu2 }
 0x193   : > { %v618_v52 = vadd.f32 %v2972_v12, %v587_v40  ;;  %v2451_v12 = vld [vmem:[%s3947_s3 + $0x44] sm:$0xf]  ;;  %v2308_v40 = vld [vmem:[%s3947_s3 + $0x8] sm:$0xf0]  ;;  %1225 = vmatpush.bf16.msrb.mxu2 %v2307_v50 }
 0x194   : > { %v2343_v62 = vor.u32 %v2451_v12, %v2340_v47  ;;  %v2311_v7 = vor.u32 %v2443_v45, %v2308_v40 }
 0x195   : > { %v3126_v53 = vadd.f32 %v2995_v27, %v618_v52 }
 0x196   : > { %1279 = vmatpush.bf16.msrb.mxu3 %v2343_v62 }
 0x197   : > { %672 = vadd.xlane.f32.xlu0 %v3126_v53  ;;  %v698_v58 = vmul.f32 %v3126_v53, %v3126_v53 }
 0x199   : > { %729 = vadd.xlane.f32.xlu2 %v698_v58 }
 0x19a   : > { %v589_v60 = vpop.f32.mrf.mxu2 }
 0x19b   : > { %v619_v49 = vadd.f32 %v2974_v14, %v589_v60  ;;  %v2332_v14 = vld [vmem:[%s3947_s3 + $0x38] sm:$0xf0] }
 0x19c   : > { %v2335_v56 = vor.u32 %v2449_v54, %v2332_v14 }
 0x19d   : > { %v3145_v1 = vadd.f32 %v2995_v27, %v619_v49 }
 0x19e   : > { %1280 = vmatpush.bf16.msrb.mxu3 %v2335_v56 }
 0x19f   : > { %674 = vadd.xlane.f32.xlu1 %v3145_v1  ;;  %v699_v8 = vmul.f32 %v3145_v1, %v3145_v1 }
 0x1a1   : > { %731 = vadd.xlane.f32.xlu0 %v699_v8 }
 0x1a2   : > { %v592_v13 = vpop.f32.mrf.mxu2  ;;  %1281 = vmatpush.bf16.msrb.mxu3 %v2327_v21 }
 0x1a3   : > { %v620_v17 = vadd.f32 %v2980_v19, %v592_v13  ;;  %v2445_v19 = vld [vmem:[%s3947_s3 + $0x14] sm:$0xf] }
 0x1a4   : > { %v649_v22 = vpop.xlane.xlu0 %648  ;;  %v2319_v29 = vor.u32 %v2445_v19, %v2316_v32 }
 0x1a5   : > { %v3176_v23 = vadd.f32 %v2995_v27, %v620_v17  ;;  %v3178_v24 = vmul.f32 0.0078125, %v649_v22 }
 0x1a6   : > { %v706_v30 = vpop.xlane.xlu1 %705  ;;  %1282 = vmatpush.bf16.msrb.mxu3 %v2319_v29 }
 0x1a7   : > { %v781_v37 = vmul.f32 %v3178_v24, %v3178_v24  ;;  %v762_v38 = vmul.f32 0.0078125, %v706_v30  ;;  %676 = vadd.xlane.f32.xlu1 %v3176_v23  ;;  %v700_v39 = vmul.f32 %v3176_v23, %v3176_v23  ;;  %v819_v40 = vsub.f32 %v3002_v36, %v3178_v24 }
 0x1a9   : > { %v800_v6 = vsub.f32 %v762_v38, %v781_v37  ;;  %733 = vadd.xlane.f32.xlu0 %v700_v39 }
 0x1aa   : > { %v594_v35 = vpop.f32.mrf.mxu2  ;;  %1283 = vmatpush.bf16.msrb.mxu3 %v2311_v7 }
 0x1ab   : > { %v838_v52 = vadd.f32 1e-05, %v800_v6  ;;  %v621_v42 = vadd.f32 %v2982_v20, %v594_v35 }
 0x1ac   : > { %v651_v57 = vpop.xlane.xlu0 %650 }
 0x1ad   : > { %2593 = vrsqrt.f32 %v838_v52  ;;  %v3211_v58 = vadd.f32 %v2995_v27, %v621_v42  ;;  %v3213_v12 = vmul.f32 0.0078125, %v651_v57  ;;  %vm863_vm3 = vweird.f32 %v838_v52 }
 0x1ae   : > { %v708_v47 = vpop.xlane.xlu1 %707 }
 0x1af   : > { %v782_v60 = vmul.f32 %v3213_v12, %v3213_v12  ;;  %v763_v62 = vmul.f32 0.0078125, %v708_v47  ;;  %678 = vadd.xlane.f32.xlu2 %v3211_v58  ;;  %v701_v20 = vmul.f32 %v3211_v58, %v3211_v58 }
 0x1b1   : > { %v801_v49 = vsub.f32 %v763_v62, %v782_v60  ;;  %735 = vadd.xlane.f32.xlu1 %v701_v20 }
 0x1b2   : > { %v597_v2 = vpop.f32.mrf.mxu2 }
 0x1b3   : > { %v2594_v3 = vpop.eup %2593  ;;  %v839_v54 = vadd.f32 1e-05, %v801_v49  ;;  %v622_v4 = vadd.f32 %v2988_v25, %v597_v2  ;;  %v3258_v2 = vld [vmem:[%s3949_s5 + $0x2] ss:$0 sm:$0xff] }
 0x1b4   : > { %v858_v14 = vmul.f32 %v2594_v3, %v838_v52  ;;  %v653_v8 = vpop.xlane.xlu2 %652  ;;  %vm864_vm2 = vweird.f32 %v2594_v3 }
 0x1b5   : > { %2595 = vrsqrt.f32 %v839_v54  ;;  %v3222_v56 = vadd.f32 %v2995_v27, %v622_v4  ;;  %v3224_v9 = vmul.f32 0.0078125, %v653_v8  ;;  %vm3245_vm4 = vmor %vm863_vm3, %vm864_vm2  ;;  %vm873_vm6 = vweird.f32 %v839_v54 }
 0x1b6   : > { %v859_v10 = vmul.f32 %v2594_v3, %v858_v14  ;;  %v710_v11 = vpop.xlane.xlu0 %709 }
 0x1b7   : > { %v783_v13 = vmul.f32 %v3224_v9, %v3224_v9  ;;  %v764_v16 = vmul.f32 0.0078125, %v710_v11  ;;  %680 = vadd.xlane.f32.xlu2 %v3222_v56  ;;  %v702_v61 = vmul.f32 %v3222_v56, %v3222_v56 }
 0x1b8   : > { %v860_v25 = vmul.f32 0.5, %v859_v10 }
 0x1b9   : > { %v802_v17 = vsub.f32 %v764_v16, %v783_v13  ;;  %737 = vadd.xlane.f32.xlu1 %v702_v61 }
 0x1ba   : > { %v861_v21 = vsub.f32 1.5, %v860_v25  ;;  %v599_v22 = vpop.f32.mrf.mxu2 }
 0x1bb   : > { %v2596_v0 = vpop.eup %2595  ;;  %v3231_v28 = vadd.f32 1e-05, %v802_v17  ;;  %v623_v30 = vadd.f32 %v2990_v26, %v599_v22 }
 0x1bc   : > { %v868_v31 = vmul.f32 %v2596_v0, %v839_v54  ;;  %v655_v19 = vpop.xlane.xlu2 %654  ;;  %v862_v32 = vmul.f32 %v2594_v3, %v861_v21  ;;  %vm874_vm5 = vweird.f32 %v2596_v0 }
 0x1bd   : > { %2597 = vrsqrt.f32 %v3231_v28  ;;  %v3236_v37 = vadd.f32 %v2995_v27, %v623_v30  ;;  %v3238_v38 = vmul.f32 0.0078125, %v655_v19  ;;  %vm875_vm7 = vmor %vm873_vm6, %vm874_vm5  ;;  %vm883_vm9 = vweird.f32 %v3231_v28 }
 0x1be   : > { %v869_v39 = vmul.f32 %v2596_v0, %v868_v31  ;;  %v712_v29 = vpop.xlane.xlu1 %711  ;;  %v866_v35 = vsel %vm3245_vm4, %v2594_v3, %v862_v32 }
 0x1bf   : > { %v784_v6 = vmul.f32 %v3238_v38, %v3238_v38  ;;  %v765_v43 = vmul.f32 0.0078125, %v712_v29  ;;  %682 = vadd.xlane.f32.xlu0 %v3236_v37  ;;  %v703_v26 = vmul.f32 %v3236_v37, %v3236_v37  ;;  %v1047_v49 = vmul.f32 %v866_v35, %v819_v40 }
 0x1c0   : > { %v870_v45 = vmul.f32 0.5, %v869_v39  ;;  %v821_v35 = vsub.f32 %v3020_v46, %v3224_v9 }
 0x1c1   : > { %v803_v50 = vsub.f32 %v765_v43, %v784_v6  ;;  %739 = vadd.xlane.f32.xlu2 %v703_v26  ;;  %v1067_v13 = vmul.f32 %v3258_v2, %v1047_v49 }
 0x1c2   : > { %v871_v52 = vsub.f32 1.5, %v870_v45  ;;  %v602_v42 = vpop.f32.mrf.mxu2 }
 0x1c3   : > { %v2598_v7 = vpop.eup %2597  ;;  %v841_v57 = vadd.f32 1e-05, %v803_v50  ;;  %v624_v47 = vadd.f32 %v3011_v41, %v602_v42  ;;  %v820_v41 = vsub.f32 %v3009_v33, %v3213_v12  ;;  %v3276_v33 = vld [vmem:[%s3949_s5 + $0x3] ss:$0 sm:$0xff] }
 0x1c4   : > { %v872_v60 = vmul.f32 %v2596_v0, %v871_v52  ;;  %v878_v62 = vmul.f32 %v2598_v7, %v3231_v28  ;;  %v657_v20 = vpop.xlane.xlu2 %656  ;;  %vm884_vm8 = vweird.f32 %v2598_v7  ;;  %v3280_v31 = vadd.f32 %v3276_v33, %v1067_v13 }
 0x1c5   : > { %2599 = vrsqrt.f32 %v841_v57  ;;  %v3261_v36 = vadd.f32 %v2995_v27, %v624_v47  ;;  %v3263_v24 = vmul.f32 0.0078125, %v657_v20  ;;  %vm885_vm10 = vmor %vm883_vm9, %vm884_vm8  ;;  %vm893_vm12 = vweird.f32 %v841_v57 }
 0x1c6   : > { %v876_v3 = vsel %vm875_vm7, %v2596_v0, %v872_v60  ;;  %v879_v54 = vmul.f32 %v2598_v7, %v878_v62  ;;  %v714_v4 = vpop.xlane.xlu1 %713  ;;  %v822_v20 = vsub.f32 %v3027_v51, %v3238_v38 }
 0x1c7   : > { %v785_v14 = vmul.f32 %v3263_v24, %v3263_v24  ;;  %v766_v8 = vmul.f32 0.0078125, %v714_v4  ;;  %684 = vadd.xlane.f32.xlu0 %v3261_v36  ;;  %v704_v10 = vmul.f32 %v3261_v36, %v3261_v36  ;;  %v1048_v27 = vmul.f32 %v876_v3, %v820_v41 }
 0x1c8   : > { %v880_v11 = vmul.f32 0.5, %v879_v54 }
 0x1c9   : > { %v804_v12 = vsub.f32 %v766_v8, %v785_v14  ;;  %741 = vadd.xlane.f32.xlu1 %v704_v10  ;;  %v1068_v25 = vmul.f32 %v3258_v2, %v1048_v27 }
 0x1ca   : > { %v881_v16 = vsub.f32 1.5, %v880_v11  ;;  %v604_v61 = vpop.f32.mrf.mxu2 }
 0x1cb   : > { %v2600_v17 = vpop.eup %2599  ;;  %v842_v21 = vadd.f32 1e-05, %v804_v12  ;;  %v3283_v19 = vadd.f32 %v3276_v33, %v1068_v25 }
 0x1cc   : > { %v882_v22 = vmul.f32 %v2598_v7, %v881_v16  ;;  %v888_v0 = vmul.f32 %v2600_v17, %v841_v57  ;;  %v659_v30 = vpop.xlane.xlu0 %658  ;;  %vm894_vm11 = vweird.f32 %v2600_v17 }
 0x1cd   : > { %2601 = vrsqrt.f32 %v842_v21  ;;  %v3285_v32 = vmul.f32 0.0078125, %v659_v30  ;;  %v1106_v6 = vpack.c.bf16 %v3283_v19, %v3280_v31  ;;  %vm895_vm13 = vmor %vm893_vm12, %vm894_vm11  ;;  %vm903_vm15 = vweird.f32 %v842_v21 }
 0x1ce   : > { %v889_v39 = vmul.f32 %v2600_v17, %v888_v0  ;;  %v716_v29 = vpop.xlane.xlu2 %715  ;;  %v886_v45 = vsel %vm885_vm10, %v2598_v7, %v882_v22 }
 0x1cf   : > { %v786_v43 = vmul.f32 %v3285_v32, %v3285_v32  ;;  %v767_v26 = vmul.f32 0.0078125, %v716_v29  ;;  %1226 = vmatmul.bf16.vlgmr.msrb.gmra.mxu2 %v1106_v6  ;;  %1284 = vmatmul.bf16.vlgmr.msrb.gmra.mxu3 %v1106_v6  ;;  %v1049_v42 = vmul.f32 %v886_v45, %v821_v35  ;;  %v823_v6 = vsub.f32 %v3034_v55, %v3263_v24 }
 0x1d0   : > { %v890_v44 = vmul.f32 0.5, %v889_v39 }
 0x1d1   : > { %v805_v50 = vsub.f32 %v767_v26, %v786_v43  ;;  %v1069_v4 = vmul.f32 %v3258_v2, %v1049_v42  ;;  %v824_v42 = vsub.f32 %v3041_v59, %v3285_v32 }
 0x1d2   : > { %v891_v40 = vsub.f32 1.5, %v890_v44 }
 0x1d3   : > { %v2602_v28 = vpop.eup %2601  ;;  %v843_v52 = vadd.f32 1e-05, %v805_v50  ;;  %v3303_v11 = vadd.f32 %v3276_v33, %v1069_v4 }
 0x1d4   : > { %v892_v47 = vmul.f32 %v2600_v17, %v891_v40  ;;  %v898_v60 = vmul.f32 %v2602_v28, %v842_v21  ;;  %v661_v62 = vpop.xlane.xlu0 %660  ;;  %vm904_vm14 = vweird.f32 %v2602_v28 }
 0x1d5   : > { %2603 = vrsqrt.f32 %v843_v52  ;;  %v3296_v49 = vmul.f32 0.0078125, %v661_v62  ;;  %vm905_vm0 = vmor %vm903_vm15, %vm904_vm14  ;;  %vm913_vm2 = vweird.f32 %v843_v52 }
 0x1d6   : > { %v899_v7 = vmul.f32 %v2602_v28, %v898_v60  ;;  %v718_v41 = vpop.xlane.xlu2 %717  ;;  %v896_v46 = vsel %vm895_vm13, %v2600_v17, %v892_v47 }
 0x1d7   : > { %v787_v9 = vmul.f32 %v3296_v49, %v3296_v49  ;;  %v768_v3 = vmul.f32 0.0078125, %v718_v41  ;;  %v1050_v54 = vmul.f32 %v896_v46, %v822_v20 }
 0x1d8   : > { %v900_v57 = vmul.f32 0.5, %v899_v7 }
 0x1d9   : > { %v806_v14 = vsub.f32 %v768_v3, %v787_v9  ;;  %v1070_v8 = vmul.f32 %v3258_v2, %v1050_v54 }
 0x1da   : > { %v901_v10 = vsub.f32 1.5, %v900_v57 }
 0x1db   : > { %v2604_v51 = vpop.eup %2603  ;;  %v844_v38 = vadd.f32 1e-05, %v806_v14  ;;  %v3306_v27 = vadd.f32 %v3276_v33, %v1070_v8 }
 0x1dc   : > { %v902_v13 = vmul.f32 %v2602_v28, %v901_v10  ;;  %v908_v12 = vmul.f32 %v2604_v51, %v843_v52  ;;  %v663_v16 = vpop.xlane.xlu1 %662  ;;  %vm914_vm1 = vweird.f32 %v2604_v51 }
 0x1dd   : > { %2605 = vrsqrt.f32 %v844_v38  ;;  %v3308_v61 = vmul.f32 0.0078125, %v663_v16  ;;  %v1107_v25 = vpack.c.bf16 %v3306_v27, %v3303_v11  ;;  %vm915_vm3 = vmor %vm913_vm2, %vm914_vm1  ;;  %vm923_vm5 = vweird.f32 %v844_v38 }
 0x1de   : > { %v909_v17 = vmul.f32 %v2604_v51, %v908_v12  ;;  %v720_v22 = vpop.xlane.xlu0 %719  ;;  %v906_v29 = vsel %vm905_vm0, %v2602_v28, %v902_v13 }
 0x1df   : > { %v788_v0 = vmul.f32 %v3308_v61, %v3308_v61  ;;  %v769_v30 = vmul.f32 0.0078125, %v720_v22  ;;  %1231 = vmatmul.bf16.gmra.mxu2 %v1107_v25  ;;  %1289 = vmatmul.bf16.gmra.mxu3 %v1107_v25  ;;  %v1051_v21 = vmul.f32 %v906_v29, %v823_v6  ;;  %v825_v22 = vsub.f32 %v3048_v63, %v3296_v49 }
 0x1e0   : > { %v910_v39 = vmul.f32 0.5, %v909_v17 }
 0x1e1   : > { %v807_v43 = vsub.f32 %v769_v30, %v788_v0  ;;  %v1071_v7 = vmul.f32 %v3258_v2, %v1051_v21 }
 0x1e2   : > { %v911_v26 = vsub.f32 1.5, %v910_v39 }
 0x1e3   : > { %v2606_v44 = vpop.eup %2605  ;;  %v845_v45 = vadd.f32 1e-05, %v807_v43  ;;  %v3325_v3 = vadd.f32 %v3276_v33, %v1071_v7 }
 0x1e4   : > { %v912_v35 = vmul.f32 %v2604_v51, %v911_v26  ;;  %v918_v50 = vmul.f32 %v2606_v44, %v844_v38  ;;  %v665_v40 = vpop.xlane.xlu1 %664  ;;  %vm924_vm4 = vweird.f32 %v2606_v44  ;;  %v826_v26 = vsub.f32 %v3061_v5, %v3308_v61 }
 0x1e5   : > { %2607 = vrsqrt.f32 %v845_v45  ;;  %v3318_v47 = vmul.f32 0.0078125, %v665_v40  ;;  %vm925_vm6 = vmor %vm923_vm5, %vm924_vm4  ;;  %vm933_vm8 = vweird.f32 %v845_v45 }
 0x1e6   : > { %v919_v28 = vmul.f32 %v2606_v44, %v918_v50  ;;  %v722_v60 = vpop.xlane.xlu0 %721  ;;  %v916_v55 = vsel %vm915_vm3, %v2604_v51, %v912_v35 }
 0x1e7   : > { %v789_v24 = vmul.f32 %v3318_v47, %v3318_v47  ;;  %v770_v62 = vmul.f32 0.0078125, %v722_v60  ;;  %v1052_v20 = vmul.f32 %v916_v55, %v824_v42 }
 0x1e8   : > { %v920_v52 = vmul.f32 0.5, %v919_v28 }
 0x1e9   : > { %v808_v41 = vsub.f32 %v770_v62, %v789_v24  ;;  %v1072_v46 = vmul.f32 %v3258_v2, %v1052_v20 }
 0x1ea   : > { %v921_v9 = vsub.f32 1.5, %v920_v52 }
 0x1eb   : > { %v2608_v59 = vpop.eup %2607  ;;  %v846_v32 = vadd.f32 1e-05, %v808_v41  ;;  %v3328_v54 = vadd.f32 %v3276_v33, %v1072_v46 }
 0x1ec   : > { %v922_v4 = vmul.f32 %v2606_v44, %v921_v9  ;;  %v928_v57 = vmul.f32 %v2608_v59, %v845_v45  ;;  %v667_v14 = vpop.xlane.xlu2 %666  ;;  %vm934_vm7 = vweird.f32 %v2608_v59  ;;  %v2466_v45 = vld [vmem:[%s3948_s4 + $0x38] sm:$0xff] }
 0x1ed   : > { %2609 = vrsqrt.f32 %v846_v32  ;;  %v3330_v8 = vmul.f32 0.0078125, %v667_v14  ;;  %v1108_v10 = vpack.c.bf16 %v3328_v54, %v3325_v3  ;;  %vm935_vm9 = vmor %vm933_vm8, %vm934_vm7  ;;  %1520 = vmatpush.bf16.msrb.mxu0 %v2466_v45  ;;  %vm943_vm11 = vweird.f32 %v846_v32 }
 0x1ee   : > { %v929_v51 = vmul.f32 %v2608_v59, %v928_v57  ;;  %v724_v13 = vpop.xlane.xlu1 %723  ;;  %v926_v17 = vsel %vm925_vm6, %v2606_v44, %v922_v4  ;;  %v827_v4 = vsub.f32 %v3074_v15, %v3318_v47 }
 0x1ef   : > { %v790_v12 = vmul.f32 %v3330_v8, %v3330_v8  ;;  %v771_v16 = vmul.f32 0.0078125, %v724_v13  ;;  %1236 = vmatmul.bf16.gmra.mxu2 %v1108_v10  ;;  %1294 = vmatmul.bf16.gmra.mxu3 %v1108_v10  ;;  %v1053_v38 = vmul.f32 %v926_v17, %v825_v22 }
 0x1f0   : > { %v930_v25 = vmul.f32 0.5, %v929_v51  ;;  %v2465_v51 = vld [vmem:[%s3948_s4 + $0x30] sm:$0xff] }
 0x1f1   : > { %v809_v0 = vsub.f32 %v771_v16, %v790_v12  ;;  %v1073_v50 = vmul.f32 %v3258_v2, %v1053_v38  ;;  %1521 = vmatpush.bf16.msrb.mxu0 %v2465_v51 }
 0x1f2   : > { %v931_v30 = vsub.f32 1.5, %v930_v25  ;;  %v828_v25 = vsub.f32 %v3081_v18, %v3330_v8 }
 0x1f3   : > { %v2610_v39 = vpop.eup %2609  ;;  %v847_v29 = vadd.f32 1e-05, %v809_v0  ;;  %v3348_v5 = vadd.f32 %v3276_v33, %v1073_v50 }
 0x1f4   : > { %v932_v6 = vmul.f32 %v2608_v59, %v931_v30  ;;  %v938_v43 = vmul.f32 %v2610_v39, %v846_v32  ;;  %vm944_vm10 = vweird.f32 %v2610_v39 }
 0x1f5   : > { %2611 = vrsqrt.f32 %v847_v29  ;;  %vm945_vm12 = vmor %vm943_vm11, %vm944_vm10  ;;  %vm953_vm14 = vweird.f32 %v847_v29 }
 0x1f6   : > { %v939_v21 = vmul.f32 %v2610_v39, %v938_v43  ;;  %v936_v35 = vsel %vm935_vm9, %v2608_v59, %v932_v6 }
 0x1f7   : > { %v1054_v44 = vmul.f32 %v936_v35, %v826_v26 }
 0x1f8   : > { %v940_v63 = vmul.f32 0.5, %v939_v21 }
 0x1f9   : > { %v1074_v49 = vmul.f32 %v3258_v2, %v1054_v44 }
 0x1fa   : > { %v941_v40 = vsub.f32 1.5, %v940_v63  ;;  %v669_v42 = vpop.xlane.xlu2 %668 }
 0x1fb   : > { %v2612_v28 = vpop.eup %2611  ;;  %v3345_v60 = vmul.f32 0.0078125, %v669_v42  ;;  %v3351_v61 = vadd.f32 %v3276_v33, %v1074_v49 }
 0x1fc   : > { %v942_v55 = vmul.f32 %v2610_v39, %v941_v40  ;;  %v948_v24 = vmul.f32 %v2612_v28, %v847_v29  ;;  %v726_v62 = vpop.xlane.xlu1 %725  ;;  %vm954_vm13 = vweird.f32 %v2612_v28 }
 0x1fd   : > { %v791_v20 = vmul.f32 %v3345_v60, %v3345_v60  ;;  %v772_v7 = vmul.f32 0.0078125, %v726_v62  ;;  %v1109_v52 = vpack.c.bf16 %v3351_v61, %v3348_v5  ;;  %vm955_vm15 = vmor %vm953_vm14, %vm954_vm13 }
 0x1fe   : > { %v949_v41 = vmul.f32 %v2612_v28, %v948_v24  ;;  %v946_v59 = vsel %vm945_vm12, %v2610_v39, %v942_v55 }
 0x1ff   : > { %v810_v46 = vsub.f32 %v772_v7, %v791_v20  ;;  %1241 = vmatmul.bf16.gmra.mxu2 %v1109_v52  ;;  %1299 = vmatmul.bf16.gmra.mxu3 %v1109_v52  ;;  %v1055_v13 = vmul.f32 %v946_v59, %v827_v4 }
 0x200   : > { %v950_v9 = vmul.f32 0.5, %v949_v41  ;;  %v2464_v41 = vld [vmem:[%s3948_s4 + $0x28] sm:$0xff] }
 0x201   : > { %v848_v57 = vadd.f32 1e-05, %v810_v46  ;;  %v1075_v30 = vmul.f32 %v3258_v2, %v1055_v13  ;;  %v2474_v46 = vld [vmem:[%s3948_s4 + $0x78] sm:$0xff]  ;;  %1522 = vmatpush.bf16.msrb.mxu0 %v2464_v41 }
 0x202   : > { %v951_v14 = vsub.f32 1.5, %v950_v9  ;;  %v671_v10 = vpop.xlane.xlu0 %670  ;;  %1578 = vmatpush.bf16.msrb.mxu1 %v2474_v46  ;;  %2485 = vmatpush.bf16.msra.mxu3 %v2474_v46 }
 0x203   : > { %2613 = vrsqrt.f32 %v848_v57  ;;  %v3362_v32 = vmul.f32 0.0078125, %v671_v10  ;;  %v3373_v18 = vadd.f32 %v3276_v33, %v1075_v30  ;;  %vm963_vm1 = vweird.f32 %v848_v57  ;;  %v2473_v30 = vld [vmem:[%s3948_s4 + $0x70] sm:$0xff] }
 0x204   : > { %v952_v12 = vmul.f32 %v2612_v28, %v951_v14  ;;  %v728_v16 = vpop.xlane.xlu2 %727 }
 0x205   : > { %v792_v15 = vmul.f32 %v3362_v32, %v3362_v32  ;;  %v773_v47 = vmul.f32 0.0078125, %v728_v16 }
 0x206   : > { %v956_v17 = vsel %vm955_vm15, %v2612_v28, %v952_v12  ;;  %1579 = vmatpush.bf16.msrb.mxu1 %v2473_v30  ;;  %2486 = vmatpush.bf16.msra.mxu3 %v2473_v30 }
 0x207   : > { %v811_v22 = vsub.f32 %v773_v47, %v792_v15  ;;  %v1056_v0 = vmul.f32 %v956_v17, %v828_v25  ;;  %v830_v17 = vsub.f32 %v3119_v48, %v3362_v32 }
 0x209   : > { %v2614_v39 = vpop.eup %2613  ;;  %v849_v38 = vadd.f32 1e-05, %v811_v22  ;;  %v1076_v6 = vmul.f32 %v3258_v2, %v1056_v0 }
 0x20a   : > { %v958_v29 = vmul.f32 %v2614_v39, %v848_v57  ;;  %v673_v43 = vpop.xlane.xlu0 %672  ;;  %vm964_vm0 = vweird.f32 %v2614_v39  ;;  %v829_v57 = vsub.f32 %v3100_v34, %v3345_v60 }
 0x20b   : > { %2615 = vrsqrt.f32 %v849_v38  ;;  %v3370_v26 = vmul.f32 0.0078125, %v673_v43  ;;  %v3376_v8 = vadd.f32 %v3276_v33, %v1076_v6  ;;  %vm965_vm2 = vmor %vm963_vm1, %vm964_vm0  ;;  %vm973_vm4 = vweird.f32 %v849_v38 }
 0x20c   : > { %v959_v21 = vmul.f32 %v2614_v39, %v958_v29  ;;  %v730_v35 = vpop.xlane.xlu2 %729 }
 0x20d   : > { %v793_v44 = vmul.f32 %v3370_v26, %v3370_v26  ;;  %v774_v50 = vmul.f32 0.0078125, %v730_v35  ;;  %v1110_v63 = vpack.c.bf16 %v3376_v8, %v3373_v18 }
 0x20e   : > { %v960_v49 = vmul.f32 0.5, %v959_v21 }
 0x20f   : > { %v812_v40 = vsub.f32 %v774_v50, %v793_v44  ;;  %1246 = vmatmul.bf16.gmra.mxu2 %v1110_v63  ;;  %1304 = vmatmul.bf16.gmra.mxu3 %v1110_v63 }
 0x210   : > { %v961_v42 = vsub.f32 1.5, %v960_v49 }
 0x211   : > { %v2616_v45 = vpop.eup %2615  ;;  %v3382_v28 = vadd.f32 1e-05, %v812_v40 }
 0x212   : > { %v962_v55 = vmul.f32 %v2614_v39, %v961_v42  ;;  %v968_v24 = vmul.f32 %v2616_v45, %v849_v38  ;;  %v675_v62 = vpop.xlane.xlu1 %674  ;;  %vm974_vm3 = vweird.f32 %v2616_v45 }
 0x213   : > { %2617 = vrsqrt.f32 %v3382_v28  ;;  %v3385_v20 = vmul.f32 0.0078125, %v675_v62  ;;  %vm975_vm5 = vmor %vm973_vm4, %vm974_vm3  ;;  %vm983_vm7 = vweird.f32 %v3382_v28 }
 0x214   : > { %v969_v7 = vmul.f32 %v2616_v45, %v968_v24  ;;  %v732_v52 = vpop.xlane.xlu0 %731  ;;  %v966_v14 = vsel %vm965_vm2, %v2614_v39, %v962_v55  ;;  %v2463_v39 = vld [vmem:[%s3948_s4 + $0x20] sm:$0xff] }
 0x215   : > { %v794_v9 = vmul.f32 %v3385_v20, %v3385_v20  ;;  %v775_v59 = vmul.f32 0.0078125, %v732_v52  ;;  %v1057_v16 = vmul.f32 %v966_v14, %v829_v57  ;;  %1523 = vmatpush.bf16.msrb.mxu0 %v2463_v39  ;;  %v2472_v52 = vld [vmem:[%s3948_s4 + $0x68] sm:$0xff] }
 0x216   : > { %v970_v4 = vmul.f32 0.5, %v969_v7  ;;  %1580 = vmatpush.bf16.msrb.mxu1 %v2472_v52  ;;  %2487 = vmatpush.bf16.msra.mxu3 %v2472_v52  ;;  %v2469_v52 = vld [vmem:[%s3948_s4 + $0x50] sm:$0xff] }
 0x217   : > { %v813_v10 = vsub.f32 %v775_v59, %v794_v9  ;;  %v1077_v32 = vmul.f32 %v3258_v2, %v1057_v16 }
 0x218   : > { %v971_v51 = vsub.f32 1.5, %v970_v4 }
 0x219   : > { %v2618_v13 = vpop.eup %2617  ;;  %v851_v12 = vadd.f32 1e-05, %v813_v10  ;;  %v3415_v63 = vadd.f32 %v3276_v33, %v1077_v32 }
 0x21a   : > { %v972_v25 = vmul.f32 %v2616_v45, %v971_v51  ;;  %v978_v15 = vmul.f32 %v2618_v13, %v3382_v28  ;;  %v677_v47 = vpop.xlane.xlu1 %676  ;;  %vm984_vm6 = vweird.f32 %v2618_v13  ;;  %v831_v28 = vsub.f32 %v3126_v53, %v3370_v26 }
 0x21b   : > { %2619 = vrsqrt.f32 %v851_v12  ;;  %v3400_v22 = vmul.f32 0.0078125, %v677_v47  ;;  %vm985_vm8 = vmor %vm983_vm7, %vm984_vm6  ;;  %vm993_vm10 = vweird.f32 %v851_v12 }
 0x21c   : > { %v979_v34 = vmul.f32 %v2618_v13, %v978_v15  ;;  %v734_v60 = vpop.xlane.xlu0 %733  ;;  %v976_v0 = vsel %vm975_vm5, %v2616_v45, %v972_v25 }
 0x21d   : > { %v795_v38 = vmul.f32 %v3400_v22, %v3400_v22  ;;  %v776_v6 = vmul.f32 0.0078125, %v734_v60  ;;  %v1058_v48 = vmul.f32 %v976_v0, %v830_v17 }
 0x21e   : > { %v980_v29 = vmul.f32 0.5, %v979_v34 }
 0x21f   : > { %v814_v43 = vsub.f32 %v776_v6, %v795_v38  ;;  %v1078_v21 = vmul.f32 %v3258_v2, %v1058_v48 }
 0x220   : > { %v981_v35 = vsub.f32 1.5, %v980_v29 }
 0x221   : > { %v2620_v44 = vpop.eup %2619  ;;  %v3412_v50 = vadd.f32 1e-05, %v814_v43  ;;  %v3418_v49 = vadd.f32 %v3276_v33, %v1078_v21  ;;  %v2470_v21 = vld [vmem:[%s3948_s4 + $0x58] sm:$0xff] }
 0x222   : > { %v982_v40 = vmul.f32 %v2618_v13, %v981_v35  ;;  %v988_v42 = vmul.f32 %v2620_v44, %v851_v12  ;;  %v679_v45 = vpop.xlane.xlu2 %678  ;;  %vm994_vm9 = vweird.f32 %v2620_v44  ;;  %v2462_v12 = vld [vmem:[%s3948_s4 + $0x18] sm:$0xff] }
 0x223   : > { %2621 = vrsqrt.f32 %v3412_v50  ;;  %v3421_v55 = vmul.f32 0.0078125, %v679_v45  ;;  %v1111_v24 = vpack.c.bf16 %v3418_v49, %v3415_v63  ;;  %vm995_vm11 = vmor %vm993_vm10, %vm994_vm9  ;;  %1524 = vmatpush.bf16.msrb.mxu0 %v2462_v12  ;;  %vm1003_vm13 = vweird.f32 %v3412_v50 }
 0x224   : > { %v989_v62 = vmul.f32 %v2620_v44, %v988_v42  ;;  %v736_v7 = vpop.xlane.xlu1 %735  ;;  %v986_v59 = vsel %vm985_vm8, %v2618_v13, %v982_v40  ;;  %v832_v13 = vsub.f32 %v3145_v1, %v3385_v20  ;;  %v2471_v20 = vld [vmem:[%s3948_s4 + $0x60] sm:$0xff] }
 0x225   : > { %v796_v41 = vmul.f32 %v3421_v55, %v3421_v55  ;;  %v777_v46 = vmul.f32 0.0078125, %v736_v7  ;;  %1251 = vmatmul.bf16.gmra.mxu2 %v1111_v24  ;;  %1309 = vmatmul.bf16.gmra.mxu3 %v1111_v24  ;;  %v1059_v51 = vmul.f32 %v986_v59, %v831_v28  ;;  %v2461_v7 = vld [vmem:[%s3948_s4 + $0x10] sm:$0xff]  ;;  %v2460_v28 = vld [vmem:[%s3948_s4 + $0x8] sm:$0xff] }
 0x226   : > { %v990_v9 = vmul.f32 0.5, %v989_v62  ;;  %1581 = vmatpush.bf16.msrb.mxu1 %v2471_v20  ;;  %2488 = vmatpush.bf16.msra.mxu3 %v2471_v20 }
 0x227   : > { %v815_v4 = vsub.f32 %v777_v46, %v796_v41  ;;  %v1079_v1 = vmul.f32 %v3258_v2, %v1059_v51  ;;  %1525 = vmatpush.bf16.msrb.mxu0 %v2461_v7 }
 0x228   : > { %v991_v14 = vsub.f32 1.5, %v990_v9 }
 0x229   : > { %v3433_v57 = vpop.eup %2621  ;;  %v3435_v10 = vadd.f32 1e-05, %v815_v4  ;;  %v3458_v29 = vadd.f32 %v3276_v33, %v1079_v1  ;;  %v833_v4 = vsub.f32 %v3176_v23, %v3400_v22  ;;  %v834_v23 = vsub.f32 %v3211_v58, %v3421_v55  ;;  %v2459_v58 = vld [vmem:[%s3948_s4] sm:$0xff] }
 0x22a   : > { %v992_v16 = vmul.f32 %v2620_v44, %v991_v14  ;;  %v998_v25 = vmul.f32 %v3433_v57, %v3412_v50  ;;  %v681_v15 = vpop.xlane.xlu2 %680  ;;  %vm1004_vm12 = vweird.f32 %v3433_v57  ;;  %1582 = vmatpush.bf16.msrb.mxu1 %v2470_v21  ;;  %2489 = vmatpush.bf16.msra.mxu3 %v2470_v21  ;;  %v2467_v55 = vld [vmem:[%s3948_s4 + $0x40] sm:$0xff] }
 0x22b   : > { %2623 = vrsqrt.f32 %v3435_v10  ;;  %v3442_v53 = vmul.f32 0.0078125, %v681_v15  ;;  %vm3481_vm14 = vmor %vm1003_vm13, %vm1004_vm12  ;;  %vm1013_vm0 = vweird.f32 %v3435_v10  ;;  %1526 = vmatpush.bf16.msrb.mxu0 %v2460_v28 }
 0x22c   : > { %v999_v26 = vmul.f32 %v3433_v57, %v998_v25  ;;  %v738_v47 = vpop.xlane.xlu1 %737  ;;  %v996_v17 = vsel %vm995_vm11, %v2620_v44, %v992_v16 }
 0x22d   : > { %v797_v34 = vmul.f32 %v3442_v53, %v3442_v53  ;;  %v778_v60 = vmul.f32 0.0078125, %v738_v47  ;;  %v1060_v0 = vmul.f32 %v996_v17, %v832_v13 }
 0x22e   : > { %v1000_v30 = vmul.f32 0.5, %v999_v26  ;;  %1583 = vmatpush.bf16.msrb.mxu1 %v2469_v52  ;;  %2490 = vmatpush.bf16.msra.mxu3 %v2469_v52  ;;  %v835_v52 = vsub.f32 %v3222_v56, %v3442_v53 }
 0x22f   : > { %v816_v39 = vsub.f32 %v778_v60, %v797_v34  ;;  %v1080_v38 = vmul.f32 %v3258_v2, %v1060_v0  ;;  %1527 = vmatpush.bf16.msrb.mxu0 %v2459_v58 }
 0x230   : > { %v1001_v6 = vsub.f32 1.5, %v1000_v30 }
 0x231   : > { %v2624_v48 = vpop.eup %2623  ;;  %v3455_v32 = vadd.f32 1e-05, %v816_v39  ;;  %v3461_v43 = vadd.f32 %v3276_v33, %v1080_v38 }
 0x232   : > { %v1002_v35 = vmul.f32 %v3433_v57, %v1001_v6  ;;  %v1008_v44 = vmul.f32 %v2624_v48, %v3435_v10  ;;  %v683_v40 = vpop.xlane.xlu0 %682  ;;  %vm1014_vm15 = vweird.f32 %v2624_v48 }
 0x233   : > { %2625 = vrsqrt.f32 %v3455_v32  ;;  %v3470_v42 = vmul.f32 0.0078125, %v683_v40  ;;  %v1112_v45 = vpack.c.bf16 %v3461_v43, %v3458_v29  ;;  %vm1015_vm1 = vmor %vm1013_vm0, %vm1014_vm15  ;;  %vm1023_vm3 = vweird.f32 %v3455_v32 }
 0x234   : > { %v1009_v24 = vmul.f32 %v2624_v48, %v1008_v44  ;;  %v740_v62 = vpop.xlane.xlu2 %739  ;;  %v1006_v50 = vsel %vm3481_vm14, %v3433_v57, %v1002_v35  ;;  %v2468_v57 = vld [vmem:[%s3948_s4 + $0x48] sm:$0xff] }
 0x235   : > { %v798_v46 = vmul.f32 %v3470_v42, %v3470_v42  ;;  %v779_v9 = vmul.f32 0.0078125, %v740_v62  ;;  %1256 = vmatmul.bf16.gmra.mxu2 %v1112_v45  ;;  %1314 = vmatmul.bf16.gmra.mxu3 %v1112_v45  ;;  %v1061_v15 = vmul.f32 %v1006_v50, %v833_v4  ;;  %v836_v28 = vsub.f32 %v3236_v37, %v3470_v42  ;;  %v1132_v37 = vld [vmem:[%s3950_s6] sm:$0x3] }
 0x236   : > { %v1010_v59 = vmul.f32 0.5, %v1009_v24  ;;  %1584 = vmatpush.bf16.msrb.mxu1 %v2468_v57  ;;  %2491 = vmatpush.bf16.msra.mxu3 %v2468_v57 }
 0x237   : > { %v817_v14 = vsub.f32 %v779_v9, %v798_v46  ;;  %v1081_v1 = vmul.f32 %v3258_v2, %v1061_v15 }
 0x238   : > { %v1011_v51 = vsub.f32 1.5, %v1010_v59 }
 0x239   : > { %v2626_v16 = vpop.eup %2625  ;;  %v855_v25 = vadd.f32 1e-05, %v817_v14  ;;  %v3515_v21 = vadd.f32 %v3276_v33, %v1081_v1 }
 0x23a   : > { %v1012_v13 = vmul.f32 %v2624_v48, %v1011_v51  ;;  %v1018_v26 = vmul.f32 %v2626_v16, %v3455_v32  ;;  %v685_v47 = vpop.xlane.xlu0 %684  ;;  %1585 = vmatpush.bf16.msrb.mxu1 %v2467_v55  ;;  %2492 = vmatpush.bf16.msra.mxu3 %v2467_v55  ;;  %vm1024_vm2 = vweird.f32 %v2626_v16 }
 0x23b   : > { %2627 = vrsqrt.f32 %v855_v25  ;;  %v3502_v22 = vmul.f32 0.0078125, %v685_v47  ;;  %vm1025_vm4 = vmor %vm1023_vm3, %vm1024_vm2  ;;  %vm1033_vm6 = vweird.f32 %v855_v25 }
 0x23c   : > { %v1016_v17 = vsel %vm1015_vm1, %v2624_v48, %v1012_v13  ;;  %v1019_v12 = vmul.f32 %v2626_v16, %v1018_v26  ;;  %v742_v34 = vpop.xlane.xlu1 %741 }
 0x23d   : > { %v799_v60 = vmul.f32 %v3502_v22, %v3502_v22  ;;  %v780_v10 = vmul.f32 0.0078125, %v742_v34  ;;  %v1062_v0 = vmul.f32 %v1016_v17, %v834_v23  ;;  %v837_v23 = vsub.f32 %v3261_v36, %v3502_v22 }
 0x23e   : > { %v1020_v20 = vmul.f32 0.5, %v1019_v12  ;;  %v3542_v17 = vperm.slane %v1132_v37, 0  ;;  %v3544_v12 = vperm.slane %v1132_v37, 1 }
 0x23f   : > { %v818_v30 = vsub.f32 %v780_v10, %v799_v60  ;;  %v1082_v39 = vmul.f32 %v3258_v2, %v1062_v0 }
 0x240   : > { %v1021_v38 = vsub.f32 1.5, %v1020_v20 }
 0x241   : > { %v2628_v6 = vpop.eup %2627  ;;  %v856_v48 = vadd.f32 1e-05, %v818_v30  ;;  %v3518_v35 = vadd.f32 %v3276_v33, %v1082_v39 }
 0x242   : > { %v1022_v44 = vmul.f32 %v2626_v16, %v1021_v38  ;;  %v1028_v40 = vmul.f32 %v2628_v6, %v855_v25  ;;  %vm1034_vm5 = vweird.f32 %v2628_v6 }
 0x243   : > { %2629 = vrsqrt.f32 %v856_v48  ;;  %v1113_v45 = vpack.c.bf16 %v3518_v35, %v3515_v21  ;;  %vm1035_vm7 = vmor %vm1033_vm6, %vm1034_vm5  ;;  %vm1043_vm9 = vweird.f32 %v856_v48 }
 0x244   : > { %v1029_v24 = vmul.f32 %v2628_v6, %v1028_v40  ;;  %v1026_v62 = vsel %vm1025_vm4, %v2626_v16, %v1022_v44 }
 0x245   : > { %1261 = vmatmul.bf16.gmra.mxu2 %v1113_v45  ;;  %1319 = vmatmul.bf16.gmra.mxu3 %v1113_v45  ;;  %v1063_v9 = vmul.f32 %v1026_v62, %v835_v52 }
 0x246   : > { %v1030_v7 = vmul.f32 0.5, %v1029_v24 }
 0x247   : > { %v1083_v51 = vmul.f32 %v3258_v2, %v1063_v9 }
 0x248   : > { %v1031_v41 = vsub.f32 1.5, %v1030_v7 }
 0x249   : > { %v2630_v46 = vpop.eup %2629  ;;  %v3530_v53 = vadd.f32 %v3276_v33, %v1083_v51 }
 0x24a   : > { %v1032_v50 = vmul.f32 %v2628_v6, %v1031_v41  ;;  %v1038_v59 = vmul.f32 %v2630_v46, %v856_v48  ;;  %vm1044_vm8 = vweird.f32 %v2630_v46 }
 0x24b   : > { %vm1045_vm10 = vmor %vm1043_vm9, %vm1044_vm8 }
 0x24c   : > { %v1036_v32 = vsel %vm1035_vm7, %v2628_v6, %v1032_v50  ;;  %v1039_v4 = vmul.f32 %v2630_v46, %v1038_v59 }
 0x24d   : > { %v1064_v14 = vmul.f32 %v1036_v32, %v836_v28 }
 0x24e   : > { %v1040_v16 = vmul.f32 0.5, %v1039_v4 }
 0x24f   : > { %v1084_v15 = vmul.f32 %v3258_v2, %v1064_v14 }
 0x250   : > { %v1041_v56 = vsub.f32 1.5, %v1040_v16 }
 0x251   : > { %v3533_v25 = vadd.f32 %v3276_v33, %v1084_v15 }
 0x252   : > { %v1042_v57 = vmul.f32 %v2630_v46, %v1041_v56  ;;  %v1227_v42 = vpop.f32.mrf.mxu2  ;;  %v1285_v13 = vpop.f32.mrf.mxu3 }
 0x253   : > { %v1114_v26 = vpack.c.bf16 %v3533_v25, %v3530_v53  ;;  %v1228_v60 = vadd.f32 %v1227_v42, %v3542_v17  ;;  %v1286_v10 = vadd.f32 %v1285_v13, %v3544_v12 }
 0x254   : > { %v1046_v47 = vsel %vm1045_vm10, %v2630_v46, %v1042_v57 }
 0x255   : > { %1266 = vmatmul.bf16.gmra.mxu2 %v1114_v26  ;;  %1324 = vmatmul.bf16.gmra.mxu3 %v1114_v26  ;;  %v1065_v34 = vmul.f32 %v1046_v47, %v837_v23  ;;  %v1334_v36 = vmax.f32 %v1228_v60, 0.0  ;;  %v1335_v22 = vmax.f32 %v1286_v10, 0.0 }
 0x257   : > { %v1085_v58 = vmul.f32 %v3258_v2, %v1065_v34 }
 0x259   : > { %v3552_v38 = vadd.f32 %v3276_v33, %v1085_v58 }
 0x25a   : > { %v1229_v0 = vpop.f32.mrf.mxu2  ;;  %v1287_v1 = vpop.f32.mrf.mxu3 }
 0x25b   : > { %v1230_v55 = vadd.f32 %v1229_v0, %v3542_v17  ;;  %v1288_v20 = vadd.f32 %v1287_v1, %v3544_v12  ;;  %v1115_v2 = vpack.c.bf16 %v3552_v38, %v3552_v38 }
 0x25d   : > { %v1336_v30 = vmax.f32 %v1230_v55, 0.0  ;;  %v1337_v39 = vmax.f32 %v1288_v20, 0.0 }
 0x25f   : > { %v1372_v6 = vpack.c.bf16 %v1336_v30, %v1334_v36  ;;  %v1373_v48 = vpack.c.bf16 %v1337_v39, %v1335_v22 }
 0x261   : > { %1528 = vmatmul.bf16.vlgmr.msrb.gmra.mxu0 %v1372_v6  ;;  %1586 = vmatmul.bf16.vlgmr.msrb.gmra.mxu1 %v1373_v48 }
 0x262   : > { %v1232_v44 = vpop.f32.mrf.mxu2  ;;  %v1290_v40 = vpop.f32.mrf.mxu3 }
 0x263   : > { %v1233_v45 = vadd.f32 %v1232_v44, %v3542_v17  ;;  %v1291_v24 = vadd.f32 %v1290_v40, %v3544_v12 }
 0x265   : > { %1271 = vmatmul.bf16.gmra.mxu2 %v1115_v2  ;;  %1329 = vmatmul.bf16.gmra.mxu3 %v1115_v2  ;;  %v1338_v41 = vmax.f32 %v1233_v45, 0.0  ;;  %v1339_v46 = vmax.f32 %v1291_v24, 0.0 }
 0x26a   : > { %v1234_v62 = vpop.f32.mrf.mxu2  ;;  %v1292_v7 = vpop.f32.mrf.mxu3 }
 0x26b   : > { %v1235_v33 = vadd.f32 %v1234_v62, %v3542_v17  ;;  %v1293_v52 = vadd.f32 %v1292_v7, %v3544_v12 }
 0x26d   : > { %v1340_v9 = vmax.f32 %v1235_v33, 0.0  ;;  %v1341_v50 = vmax.f32 %v1293_v52, 0.0 }
 0x26f   : > { %v1374_v59 = vpack.c.bf16 %v1340_v9, %v1338_v41  ;;  %v1375_v28 = vpack.c.bf16 %v1341_v50, %v1339_v46 }
 0x271   : > { %1533 = vmatmul.bf16.gmra.mxu0 %v1374_v59  ;;  %1591 = vmatmul.bf16.gmra.mxu1 %v1375_v28 }
 0x272   : > { %v1237_v32 = vpop.f32.mrf.mxu2  ;;  %v1295_v4 = vpop.f32.mrf.mxu3 }
 0x273   : > { %v1238_v14 = vadd.f32 %v1237_v32, %v3542_v17  ;;  %v1296_v51 = vadd.f32 %v1295_v4, %v3544_v12 }
 0x275   : > { %v1342_v37 = vmax.f32 %v1238_v14, 0.0  ;;  %v1343_v42 = vmax.f32 %v1296_v51, 0.0 }
 0x27a   : > { %v1239_v16 = vpop.f32.mrf.mxu2  ;;  %v1297_v15 = vpop.f32.mrf.mxu3 }
 0x27b   : > { %v1240_v56 = vadd.f32 %v1239_v16, %v3542_v17  ;;  %v1298_v57 = vadd.f32 %v1297_v15, %v3544_v12 }
 0x27d   : > { %v1344_v13 = vmax.f32 %v1240_v56, 0.0  ;;  %v1345_v26 = vmax.f32 %v1298_v57, 0.0 }
 0x27f   : > { %v1376_v47 = vpack.c.bf16 %v1344_v13, %v1342_v37  ;;  %v1377_v23 = vpack.c.bf16 %v1345_v26, %v1343_v42 }
 0x281   : > { %1538 = vmatmul.bf16.gmra.mxu0 %v1376_v47  ;;  %1596 = vmatmul.bf16.gmra.mxu1 %v1377_v23 }
 0x282   : > { %v1242_v34 = vpop.f32.mrf.mxu2  ;;  %v1300_v60 = vpop.f32.mrf.mxu3 }
 0x283   : > { %v1243_v10 = vadd.f32 %v1242_v34, %v3542_v17  ;;  %v1301_v0 = vadd.f32 %v1300_v60, %v3544_v12 }
 0x285   : > { %v1346_v36 = vmax.f32 %v1243_v10, 0.0  ;;  %v1347_v22 = vmax.f32 %v1301_v0, 0.0 }
 0x28a   : > { %v1244_v1 = vpop.f32.mrf.mxu2  ;;  %v1302_v58 = vpop.f32.mrf.mxu3 }
 0x28b   : > { %v1245_v55 = vadd.f32 %v1244_v1, %v3542_v17  ;;  %v1303_v20 = vadd.f32 %v1302_v58, %v3544_v12 }
 0x28d   : > { %v1348_v30 = vmax.f32 %v1245_v55, 0.0  ;;  %v1349_v39 = vmax.f32 %v1303_v20, 0.0 }
 0x28f   : > { %v1378_v6 = vpack.c.bf16 %v1348_v30, %v1346_v36  ;;  %v1379_v48 = vpack.c.bf16 %v1349_v39, %v1347_v22 }
 0x291   : > { %1543 = vmatmul.bf16.gmra.mxu0 %v1378_v6  ;;  %1601 = vmatmul.bf16.gmra.mxu1 %v1379_v48 }
 0x292   : > { %v1247_v44 = vpop.f32.mrf.mxu2  ;;  %v1305_v40 = vpop.f32.mrf.mxu3 }
 0x293   : > { %v1248_v2 = vadd.f32 %v1247_v44, %v3542_v17  ;;  %v1306_v45 = vadd.f32 %v1305_v40, %v3544_v12 }
 0x295   : > { %v1350_v52 = vmax.f32 %v1248_v2, 0.0  ;;  %v1351_v41 = vmax.f32 %v1306_v45, 0.0 }
 0x29a   : > { %v1249_v24 = vpop.f32.mrf.mxu2  ;;  %v1307_v62 = vpop.f32.mrf.mxu3 }
 0x29b   : > { %v1250_v7 = vadd.f32 %v1249_v24, %v3542_v17  ;;  %v1308_v33 = vadd.f32 %v1307_v62, %v3544_v12 }
 0x29d   : > { %v1352_v46 = vmax.f32 %v1250_v7, 0.0  ;;  %v1353_v9 = vmax.f32 %v1308_v33, 0.0 }
 0x29f   : > { %v1380_v50 = vpack.c.bf16 %v1352_v46, %v1350_v52  ;;  %v1381_v59 = vpack.c.bf16 %v1353_v9, %v1351_v41 }
 0x2a1   : > { %1548 = vmatmul.bf16.gmra.mxu0 %v1380_v50  ;;  %1606 = vmatmul.bf16.gmra.mxu1 %v1381_v59 }
 0x2a8   : > { %v1252_v28 = vpop.f32.mrf.mxu2  ;;  %v1310_v32 = vpop.f32.mrf.mxu3 }
 0x2a9   : > { %v1253_v4 = vadd.f32 %v1252_v28, %v3542_v17  ;;  %v1311_v14 = vadd.f32 %v1310_v32, %v3544_v12 }
 0x2ab   : > { %v1354_v57 = vmax.f32 %v1253_v4, 0.0  ;;  %v1355_v37 = vmax.f32 %v1311_v14, 0.0 }
 0x2b0   : > { %v1254_v51 = vpop.f32.mrf.mxu2  ;;  %v1312_v16 = vpop.f32.mrf.mxu3 }
 0x2b1   : > { %v1255_v15 = vadd.f32 %v1254_v51, %v3542_v17  ;;  %v1313_v56 = vadd.f32 %v1312_v16, %v3544_v12 }
 0x2b3   : > { %v1356_v42 = vmax.f32 %v1255_v15, 0.0  ;;  %v1357_v13 = vmax.f32 %v1313_v56, 0.0 }
 0x2b5   : > { %v1382_v26 = vpack.c.bf16 %v1356_v42, %v1354_v57  ;;  %v1383_v47 = vpack.c.bf16 %v1357_v13, %v1355_v37  ;;  %v3589_v57 = vld [vmem:[%s3949_s5 + $0x4] ss:$0 sm:$0xff] }
 0x2b7   : > { %1553 = vmatmul.bf16.gmra.mxu0 %v1382_v26  ;;  %1611 = vmatmul.bf16.gmra.mxu1 %v1383_v47 }
 0x2b8   : > { %v1257_v23 = vpop.f32.mrf.mxu2  ;;  %v1315_v34 = vpop.f32.mrf.mxu3 }
 0x2b9   : > { %v1258_v60 = vadd.f32 %v1257_v23, %v3542_v17  ;;  %v1316_v10 = vadd.f32 %v1315_v34, %v3544_v12 }
 0x2bb   : > { %v1358_v20 = vmax.f32 %v1258_v60, 0.0  ;;  %v1359_v36 = vmax.f32 %v1316_v10, 0.0 }
 0x2c0   : > { %v1259_v0 = vpop.f32.mrf.mxu2  ;;  %v1317_v1 = vpop.f32.mrf.mxu3 }
 0x2c1   : > { %v1260_v58 = vadd.f32 %v1259_v0, %v3542_v17  ;;  %v1318_v55 = vadd.f32 %v1317_v1, %v3544_v12 }
 0x2c3   : > { %v1360_v22 = vmax.f32 %v1260_v58, 0.0  ;;  %v1361_v30 = vmax.f32 %v1318_v55, 0.0 }
 0x2c5   : > { %v1384_v39 = vpack.c.bf16 %v1360_v22, %v1358_v20  ;;  %v1385_v6 = vpack.c.bf16 %v1361_v30, %v1359_v36 }
 0x2c7   : > { %1558 = vmatmul.bf16.gmra.mxu0 %v1384_v39  ;;  %1616 = vmatmul.bf16.gmra.mxu1 %v1385_v6 }
 0x2c8   : > { %v1262_v48 = vpop.f32.mrf.mxu2  ;;  %v1320_v44 = vpop.f32.mrf.mxu3 }
 0x2c9   : > { %v1263_v40 = vadd.f32 %v1262_v48, %v3542_v17  ;;  %v1321_v2 = vadd.f32 %v1320_v44, %v3544_v12 }
 0x2cb   : > { %v1362_v33 = vmax.f32 %v1263_v40, 0.0  ;;  %v1363_v52 = vmax.f32 %v1321_v2, 0.0 }
 0x2d0   : > { %v1264_v45 = vpop.f32.mrf.mxu2  ;;  %v1322_v24 = vpop.f32.mrf.mxu3 }
 0x2d1   : > { %v1265_v62 = vadd.f32 %v1264_v45, %v3542_v17  ;;  %v1323_v7 = vadd.f32 %v1322_v24, %v3544_v12 }
 0x2d3   : > { %v1364_v41 = vmax.f32 %v1265_v62, 0.0  ;;  %v1365_v46 = vmax.f32 %v1323_v7, 0.0 }
 0x2d5   : > { %v1386_v9 = vpack.c.bf16 %v1364_v41, %v1362_v33  ;;  %v1387_v50 = vpack.c.bf16 %v1365_v46, %v1363_v52 }
 0x2d7   : > { %1563 = vmatmul.bf16.gmra.mxu0 %v1386_v9  ;;  %1621 = vmatmul.bf16.gmra.mxu1 %v1387_v50 }
 0x2d8   : > { %v1267_v59 = vpop.f32.mrf.mxu2  ;;  %v1325_v28 = vpop.f32.mrf.mxu3 }
 0x2d9   : > { %v1268_v32 = vadd.f32 %v1267_v59, %v3542_v17  ;;  %v1326_v4 = vadd.f32 %v1325_v28, %v3544_v12 }
 0x2db   : > { %v1366_v26 = vmax.f32 %v1268_v32, 0.0  ;;  %v1367_v47 = vmax.f32 %v1326_v4, 0.0 }
 0x2de   : > { %v1529_v14 = vpop.f32.mrf.mxu0  ;;  %v1587_v51 = vpop.f32.mrf.mxu1 }
 0x2df   : > { %v1588_v16 = vadd.f32 %v1587_v51, %v1529_v14 }
 0x2e0   : > { %v1269_v15 = vpop.f32.mrf.mxu2  ;;  %v1327_v56 = vpop.f32.mrf.mxu3 }
 0x2e1   : > { %v1270_v37 = vadd.f32 %v1269_v15, %v3542_v17  ;;  %v1328_v42 = vadd.f32 %v1327_v56, %v3544_v12  ;;  %v1636_v13 = vadd.f32 %v1588_v16, %v3280_v31 }
 0x2e3   : > { %v1368_v23 = vmax.f32 %v1270_v37, 0.0  ;;  %v1369_v34 = vmax.f32 %v1328_v42, 0.0  ;;  %v3595_v60 = vadd.f32 %v3589_v57, %v1636_v13 }
 0x2e5   : > { %v1388_v10 = vpack.c.bf16 %v1368_v23, %v1366_v26  ;;  %v1389_v0 = vpack.c.bf16 %v1369_v34, %v1367_v47  ;;  %1678 = vadd.xlane.f32.xlu2 %v3595_v60  ;;  %v1716_v1 = vmul.f32 %v3595_v60, %v3595_v60 }
 0x2e6   : > { %v1531_v58 = vpop.f32.mrf.mxu0  ;;  %v1589_v55 = vpop.f32.mrf.mxu1 }
 0x2e7   : > { %1568 = vmatmul.bf16.gmra.mxu0 %v1388_v10  ;;  %1626 = vmatmul.bf16.gmra.mxu1 %v1389_v0  ;;  %v1590_v20 = vadd.f32 %v1589_v55, %v1531_v58 }
 0x2e8   : > { %1735 = vadd.xlane.f32.xlu0 %v1716_v1  ;;  %v1272_v31 = vpop.f32.mrf.mxu2  ;;  %v1330_v36 = vpop.f32.mrf.mxu3 }
 0x2e9   : > { %v1331_v22 = vadd.f32 %v1330_v36, %v3544_v12  ;;  %v1637_v30 = vadd.f32 %v1590_v20, %v3283_v19  ;;  %v1273_v48 = vadd.f32 %v1272_v31, %v3542_v17 }
 0x2eb   : > { %v1371_v39 = vmax.f32 %v1331_v22, 0.0  ;;  %v3603_v6 = vadd.f32 %v3589_v57, %v1637_v30  ;;  %v1370_v19 = vmax.f32 %v1273_v48, 0.0 }
 0x2ed   : > { %v1391_v44 = vpack.c.bf16 %v1371_v39, %v1371_v39  ;;  %v1717_v40 = vmul.f32 %v3603_v6, %v3603_v6  ;;  %v1390_v17 = vpack.c.bf16 %v1370_v19, %v1370_v19 }
 0x2ee   : > { %v1534_v2 = vpop.f32.mrf.mxu0  ;;  %v1592_v45 = vpop.f32.mrf.mxu1 }
 0x2ef   : > { %1631 = vmatmul.bf16.vlgmr.msra.gmra.mxu3 %v1391_v44  ;;  %v1593_v24 = vadd.f32 %v1592_v45, %v1534_v2  ;;  %1737 = vadd.xlane.f32.xlu1 %v1717_v40 }
 0x2f0   : > { %1680 = vadd.xlane.f32.xlu0 %v3603_v6  ;;  %v1274_v12 = vpop.f32.mrf.mxu2  ;;  %v1332_v62 = vpop.f32.mrf.mxu3 }
 0x2f1   : > { %v1638_v7 = vadd.f32 %v1593_v24, %v3303_v11 }
 0x2f3   : > { %v3611_v33 = vadd.f32 %v3589_v57, %v1638_v7 }
 0x2f5   : > { %v1718_v52 = vmul.f32 %v3611_v33, %v3611_v33 }
 0x2f6   : > { %v1536_v41 = vpop.f32.mrf.mxu0  ;;  %v1594_v46 = vpop.f32.mrf.mxu1 }
 0x2f7   : > { %1573 = vmatmul.bf16.gmra.mxu0 %v1390_v17  ;;  %v1595_v9 = vadd.f32 %v1594_v46, %v1536_v41  ;;  %1739 = vadd.xlane.f32.xlu2 %v1718_v52 }
 0x2f8   : > { %1682 = vadd.xlane.f32.xlu1 %v3611_v33 }
 0x2f9   : > { %v1639_v50 = vadd.f32 %v1595_v9, %v3306_v27 }
 0x2fb   : > { %v3618_v59 = vadd.f32 %v3589_v57, %v1639_v50 }
 0x2fd   : > { %v1719_v11 = vmul.f32 %v3618_v59, %v3618_v59 }
 0x2fe   : > { %v1539_v28 = vpop.f32.mrf.mxu0  ;;  %v1597_v32 = vpop.f32.mrf.mxu1 }
 0x2ff   : > { %v1598_v4 = vadd.f32 %v1597_v32, %v1539_v28  ;;  %1741 = vadd.xlane.f32.xlu0 %v1719_v11  ;;  %1684 = vadd.xlane.f32.xlu2 %v3618_v59 }
 0x301   : > { %v1640_v14 = vadd.f32 %v1598_v4, %v3325_v3 }
 0x303   : > { %v3625_v51 = vadd.f32 %v3589_v57, %v1640_v14 }
 0x305   : > { %v1720_v27 = vmul.f32 %v3625_v51, %v3625_v51 }
 0x306   : > { %v1541_v16 = vpop.f32.mrf.mxu0  ;;  %v1599_v15 = vpop.f32.mrf.mxu1 }
 0x307   : > { %v1600_v56 = vadd.f32 %v1599_v15, %v1541_v16  ;;  %1686 = vadd.xlane.f32.xlu0 %v3625_v51  ;;  %1743 = vadd.xlane.f32.xlu1 %v1720_v27 }
 0x309   : > { %v1641_v37 = vadd.f32 %v1600_v56, %v3328_v54 }
 0x30b   : > { %v3632_v42 = vadd.f32 %v3589_v57, %v1641_v37 }
 0x30d   : > { %v1721_v3 = vmul.f32 %v3632_v42, %v3632_v42 }
 0x30e   : > { %v1544_v13 = vpop.f32.mrf.mxu0  ;;  %v1602_v26 = vpop.f32.mrf.mxu1 }
 0x30f   : > { %v1603_v47 = vadd.f32 %v1602_v26, %v1544_v13  ;;  %1745 = vadd.xlane.f32.xlu2 %v1721_v3  ;;  %1688 = vadd.xlane.f32.xlu1 %v3632_v42 }
 0x311   : > { %v1642_v23 = vadd.f32 %v1603_v47, %v3348_v5 }
 0x313   : > { %v3639_v34 = vadd.f32 %v3589_v57, %v1642_v23 }
 0x315   : > { %v1722_v54 = vmul.f32 %v3639_v34, %v3639_v34 }
 0x316   : > { %v1546_v10 = vpop.f32.mrf.mxu0  ;;  %v1604_v0 = vpop.f32.mrf.mxu1 }
 0x317   : > { %v1605_v1 = vadd.f32 %v1604_v0, %v1546_v10  ;;  %1747 = vadd.xlane.f32.xlu0 %v1722_v54  ;;  %1690 = vadd.xlane.f32.xlu2 %v3639_v34 }
 0x319   : > { %v1643_v58 = vadd.f32 %v1605_v1, %v3351_v61 }
 0x31b   : > { %v3646_v55 = vadd.f32 %v3589_v57, %v1643_v58 }
 0x31d   : > { %v1723_v5 = vmul.f32 %v3646_v55, %v3646_v55 }
 0x31e   : > { %v1549_v20 = vpop.f32.mrf.mxu0  ;;  %v1607_v31 = vpop.f32.mrf.mxu1 }
 0x31f   : > { %v1608_v36 = vadd.f32 %v1607_v31, %v1549_v20  ;;  %1692 = vadd.xlane.f32.xlu0 %v3646_v55  ;;  %1749 = vadd.xlane.f32.xlu1 %v1723_v5 }
 0x321   : > { %v1644_v22 = vadd.f32 %v1608_v36, %v3373_v18 }
 0x323   : > { %v3653_v30 = vadd.f32 %v3589_v57, %v1644_v22 }
 0x325   : > { %v1724_v61 = vmul.f32 %v3653_v30, %v3653_v30 }
 0x326   : > { %v1551_v39 = vpop.f32.mrf.mxu0  ;;  %v1609_v48 = vpop.f32.mrf.mxu1 }
 0x327   : > { %v1610_v44 = vadd.f32 %v1609_v48, %v1551_v39  ;;  %1694 = vadd.xlane.f32.xlu1 %v3653_v30  ;;  %1751 = vadd.xlane.f32.xlu2 %v1724_v61 }
 0x329   : > { %v1645_v40 = vadd.f32 %v1610_v44, %v3376_v8 }
 0x32b   : > { %v3660_v2 = vadd.f32 %v3589_v57, %v1645_v40 }
 0x32d   : > { %v1725_v18 = vmul.f32 %v3660_v2, %v3660_v2 }
 0x32f   : > { %1696 = vadd.xlane.f32.xlu2 %v3660_v2  ;;  %1753 = vadd.xlane.f32.xlu0 %v1725_v18 }
 0x334   : > { %v1554_v45 = vpop.f32.mrf.mxu0  ;;  %v1612_v24 = vpop.f32.mrf.mxu1 }
 0x335   : > { %v1613_v12 = vadd.f32 %v1612_v24, %v1554_v45 }
 0x337   : > { %v1646_v62 = vadd.f32 %v1613_v12, %v3415_v63 }
 0x339   : > { %v3667_v19 = vadd.f32 %v3589_v57, %v1646_v62 }
 0x33b   : > { %1698 = vadd.xlane.f32.xlu0 %v3667_v19  ;;  %v1726_v8 = vmul.f32 %v3667_v19, %v3667_v19 }
 0x33c   : > { %v1556_v7 = vpop.f32.mrf.mxu0  ;;  %v1614_v17 = vpop.f32.mrf.mxu1 }
 0x33d   : > { %v1615_v52 = vadd.f32 %v1614_v17, %v1556_v7  ;;  %1755 = vadd.xlane.f32.xlu1 %v1726_v8 }
 0x33f   : > { %v1647_v41 = vadd.f32 %v1615_v52, %v3418_v49 }
 0x341   : > { %v3674_v46 = vadd.f32 %v3589_v57, %v1647_v41 }
 0x343   : > { %v1727_v63 = vmul.f32 %v3674_v46, %v3674_v46 }
 0x344   : > { %v1559_v9 = vpop.f32.mrf.mxu0  ;;  %v1617_v50 = vpop.f32.mrf.mxu1 }
 0x345   : > { %v1618_v11 = vadd.f32 %v1617_v50, %v1559_v9  ;;  %1700 = vadd.xlane.f32.xlu1 %v3674_v46  ;;  %1757 = vadd.xlane.f32.xlu2 %v1727_v63 }
 0x347   : > { %v1648_v28 = vadd.f32 %v1618_v11, %v3458_v29 }
 0x349   : > { %v3681_v32 = vadd.f32 %v3589_v57, %v1648_v28 }
 0x34b   : > { %v1728_v49 = vmul.f32 %v3681_v32, %v3681_v32 }
 0x34c   : > { %v1561_v4 = vpop.f32.mrf.mxu0  ;;  %v1619_v14 = vpop.f32.mrf.mxu1 }
 0x34d   : > { %v1620_v27 = vadd.f32 %v1619_v14, %v1561_v4  ;;  %1702 = vadd.xlane.f32.xlu2 %v3681_v32  ;;  %1759 = vadd.xlane.f32.xlu0 %v1728_v49 }
 0x34f   : > { %v1649_v16 = vadd.f32 %v1620_v27, %v3461_v43 }
 0x351   : > { %v3688_v15 = vadd.f32 %v3589_v57, %v1649_v16 }
 0x353   : > { %v1729_v29 = vmul.f32 %v3688_v15, %v3688_v15 }
 0x354   : > { %v1564_v56 = vpop.f32.mrf.mxu0  ;;  %v1622_v37 = vpop.f32.mrf.mxu1 }
 0x355   : > { %v1623_v3 = vadd.f32 %v1622_v37, %v1564_v56  ;;  %1704 = vadd.xlane.f32.xlu0 %v3688_v15  ;;  %1761 = vadd.xlane.f32.xlu1 %v1729_v29 }
 0x357   : > { %v1650_v13 = vadd.f32 %v1623_v3, %v3515_v21 }
 0x358   : > { %v1679_v26 = vpop.xlane.xlu2 %1678 }
 0x359   : > { %v3695_v47 = vadd.f32 %v3589_v57, %v1650_v13  ;;  %v3697_v23 = vmul.f32 0.0078125, %v1679_v26  ;;  %v3737_v13 = vld [vmem:[%s3949_s5 + $0x5] ss:$0 sm:$0xff] }
 0x35b   : > { %v1736_v43 = vpop.xlane.xlu0 %1735  ;;  %v1730_v54 = vmul.f32 %v3695_v47, %v3695_v47  ;;  %v1811_v10 = vmul.f32 %v3697_v23, %v3697_v23  ;;  %v1849_v3 = vsub.f32 %v3595_v60, %v3697_v23  ;;  %v3748_v60 = vld [vmem:[%s3949_s5 + $0x6] ss:$0 sm:$0xff] }
 0x35c   : > { %v1792_v0 = vmul.f32 0.0078125, %v1736_v43  ;;  %v1566_v1 = vpop.f32.mrf.mxu0  ;;  %v1624_v58 = vpop.f32.mrf.mxu1 }
 0x35d   : > { %v1625_v5 = vadd.f32 %v1624_v58, %v1566_v1  ;;  %1706 = vadd.xlane.f32.xlu1 %v3695_v47  ;;  %1763 = vadd.xlane.f32.xlu2 %v1730_v54 }
 0x35e   : > { %v1830_v21 = vsub.f32 %v1792_v0, %v1811_v10 }
 0x35f   : > { %v1651_v20 = vadd.f32 %v1625_v5, %v3518_v35 }
 0x360   : > { %v1868_v31 = vadd.f32 1e-05, %v1830_v21 }
 0x361   : > { %v3706_v36 = vadd.f32 %v3589_v57, %v1651_v20 }
 0x362   : > { %2631 = vrsqrt.f32 %v1868_v31  ;;  %v1738_v61 = vpop.xlane.xlu1 %1737  ;;  %vm1893_vm12 = vweird.f32 %v1868_v31 }
 0x363   : > { %v1681_v22 = vpop.xlane.xlu0 %1680  ;;  %v1731_v39 = vmul.f32 %v3706_v36, %v3706_v36  ;;  %v1793_v45 = vmul.f32 0.0078125, %v1738_v61 }
 0x364   : > { %v3710_v48 = vmul.f32 0.0078125, %v1681_v22  ;;  %v1569_v44 = vpop.f32.mrf.mxu0  ;;  %v1627_v40 = vpop.f32.mrf.mxu1 }
 0x365   : > { %v1628_v18 = vadd.f32 %v1627_v40, %v1569_v44  ;;  %1708 = vadd.xlane.f32.xlu2 %v3706_v36  ;;  %1765 = vadd.xlane.f32.xlu0 %v1731_v39 }
 0x366   : > { %v1812_v35 = vmul.f32 %v3710_v48, %v3710_v48 }
 0x367   : > { %v1652_v24 = vadd.f32 %v1628_v18, %v3530_v53 }
 0x368   : > { %v2632_v12 = vpop.eup %2631  ;;  %v1831_v62 = vsub.f32 %v1793_v45, %v1812_v35 }
 0x369   : > { %v1888_v8 = vmul.f32 %v2632_v12, %v1868_v31  ;;  %v3719_v63 = vadd.f32 %v3589_v57, %v1652_v24  ;;  %vm1894_vm11 = vweird.f32 %v2632_v12 }
 0x36a   : > { %v3716_v7 = vadd.f32 1e-05, %v1831_v62  ;;  %v1740_v52 = vpop.xlane.xlu2 %1739  ;;  %vm1895_vm13 = vmor %vm1893_vm12, %vm1894_vm11 }
 0x36b   : > { %v1889_v17 = vmul.f32 %v2632_v12, %v1888_v8  ;;  %v1683_v41 = vpop.xlane.xlu1 %1682  ;;  %v1794_v49 = vmul.f32 0.0078125, %v1740_v52  ;;  %v1732_v40 = vmul.f32 %v3719_v63, %v3719_v63 }
 0x36c   : > { %2633 = vrsqrt.f32 %v3716_v7  ;;  %v3722_v9 = vmul.f32 0.0078125, %v1683_v41  ;;  %v1571_v50 = vpop.f32.mrf.mxu0  ;;  %v1629_v11 = vpop.f32.mrf.mxu1  ;;  %vm1903_vm15 = vweird.f32 %v3716_v7 }
 0x36d   : > { %v1890_v28 = vmul.f32 0.5, %v1889_v17  ;;  %v1630_v53 = vadd.f32 %v1629_v11, %v1571_v50  ;;  %1710 = vadd.xlane.f32.xlu0 %v3719_v63 }
 0x36e   : > { %v1813_v4 = vmul.f32 %v3722_v9, %v3722_v9 }
 0x36f   : > { %v1891_v14 = vsub.f32 1.5, %v1890_v28  ;;  %v1653_v27 = vadd.f32 %v1630_v53, %v3533_v25 }
 0x370   : > { %v1832_v16 = vsub.f32 %v1794_v49, %v1813_v4 }
 0x371   : > { %v1892_v29 = vmul.f32 %v2632_v12, %v1891_v14  ;;  %v3730_v56 = vadd.f32 %v3589_v57, %v1653_v27 }
 0x372   : > { %v2634_v37 = vpop.eup %2633  ;;  %v3739_v26 = vadd.f32 1e-05, %v1832_v16  ;;  %v1632_v25 = vpop.f32.mrf.mxu3 }
 0x373   : > { %v1896_v43 = vsel %vm1895_vm13, %v2632_v12, %v1892_v29  ;;  %v1898_v54 = vmul.f32 %v2634_v37, %v3716_v7  ;;  %v1742_v10 = vpop.xlane.xlu0 %1741  ;;  %v1685_v0 = vpop.xlane.xlu2 %1684  ;;  %1712 = vadd.xlane.f32.xlu1 %v3730_v56  ;;  %vm1904_vm14 = vweird.f32 %v2634_v37  ;;  %v1733_v16 = vmul.f32 %v3730_v56, %v3730_v56 }
 0x374   : > { %v2077_v23 = vmul.f32 %v1896_v43, %v1849_v3  ;;  %2635 = vrsqrt.f32 %v3739_v26  ;;  %v1574_v1 = vpop.f32.mrf.mxu0  ;;  %v3751_v5 = vmul.f32 0.0078125, %v1685_v0  ;;  %v1795_v22 = vmul.f32 0.0078125, %v1742_v10  ;;  %vm1905_vm0 = vmor %vm1903_vm15, %vm1904_vm14 }
 0x375   : > { %v1899_v58 = vmul.f32 %v2634_v37, %v1898_v54  ;;  %v1633_v21 = vadd.f32 %v1632_v25, %v1574_v1  ;;  %vm1913_vm2 = vweird.f32 %v3739_v26  ;;  %v1851_v10 = vsub.f32 %v3611_v33, %v3722_v9 }
 0x376   : > { %v2097_v20 = vmul.f32 %v3737_v13, %v2077_v23  ;;  %v1814_v61 = vmul.f32 %v3751_v5, %v3751_v5 }
 0x377   : > { %v1900_v31 = vmul.f32 0.5, %v1899_v58  ;;  %v1654_v39 = vadd.f32 %v1633_v21, %v3552_v38 }
 0x378   : > { %v2117_v44 = vadd.f32 %v3748_v60, %v2097_v20  ;;  %v1833_v35 = vsub.f32 %v1795_v22, %v1814_v61 }
 0x379   : > { %v1901_v18 = vsub.f32 1.5, %v1900_v31  ;;  %v3761_v45 = vadd.f32 %v3589_v57, %v1654_v39  ;;  %v1850_v57 = vsub.f32 %v3603_v6, %v3710_v48 }
 0x37a   : > { %v2636_v24 = vpop.eup %2635  ;;  %2136 = vst [vmem:[%s3763_s15] sm:$0xff] %v2117_v44  ;;  %v1634_v12 = vpop.f32.mrf.mxu3  ;;  %v1871_v8 = vadd.f32 1e-05, %v1833_v35 }
 0x37b   : > { %v1902_v62 = vmul.f32 %v2634_v37, %v1901_v18  ;;  %v1908_v38 = vmul.f32 %v2636_v24, %v3739_v26  ;;  %v1687_v17 = vpop.xlane.xlu0 %1686  ;;  %v1744_v52 = vpop.xlane.xlu1 %1743  ;;  %1767 = vadd.xlane.f32.xlu1 %v1732_v40  ;;  %1714 = vadd.xlane.f32.xlu2 %v3761_v45  ;;  %v1734_v11 = vmul.f32 %v3761_v45, %v3761_v45  ;;  %vm1914_vm1 = vweird.f32 %v2636_v24 }
 0x37c   : > { %v3772_v41 = vmul.f32 0.0078125, %v1687_v17  ;;  %v1576_v50 = vpop.f32.mrf.mxu0  ;;  %2637 = vrsqrt.f32 %v1871_v8  ;;  %v1796_v4 = vmul.f32 0.0078125, %v1744_v52  ;;  %vm1915_vm3 = vmor %vm1913_vm2, %vm1914_vm1  ;;  %vm1923_vm5 = vweird.f32 %v1871_v8 }
 0x37d   : > { %v1906_v7 = vsel %vm1905_vm0, %v2634_v37, %v1902_v62  ;;  %v1909_v28 = vmul.f32 %v2636_v24, %v1908_v38  ;;  %1771 = vadd.xlane.f32.xlu0 %v1734_v11  ;;  %v1852_v62 = vsub.f32 %v3618_v59, %v3751_v5 }
 0x37e   : > { %v2078_v53 = vmul.f32 %v1906_v7, %v1850_v57  ;;  %v1815_v49 = vmul.f32 %v3772_v41, %v3772_v41 }
 0x37f   : > { %v1910_v14 = vmul.f32 0.5, %v1909_v28 }
 0x380   : > { %v2098_v6 = vmul.f32 %v3737_v13, %v2078_v53  ;;  %v1834_v48 = vsub.f32 %v1796_v4, %v1815_v49 }
 0x381   : > { %v1911_v27 = vsub.f32 1.5, %v1910_v14 }
 0x382   : > { %v2118_v29 = vadd.f32 %v3748_v60, %v2098_v6  ;;  %v1872_v37 = vadd.f32 1e-05, %v1834_v48  ;;  %v2638_v3 = vpop.eup %2637  ;;  %v1746_v43 = vpop.xlane.xlu2 %1745  ;;  %v1853_v6 = vsub.f32 %v3625_v51, %v3772_v41 }
 0x383   : > { %v1912_v25 = vmul.f32 %v2636_v24, %v1911_v27  ;;  %v1689_v54 = vpop.xlane.xlu1 %1688  ;;  %1769 = vadd.xlane.f32.xlu2 %v1733_v16  ;;  %v1918_v0 = vmul.f32 %v2638_v3, %v1871_v8  ;;  %v1797_v20 = vmul.f32 0.0078125, %v1746_v43  ;;  %vm1924_vm4 = vweird.f32 %v2638_v3 }
 0x384   : > { %2137 = vst [vmem:[%s3763_s15 + $0x8] sm:$0xff] %v2118_v29  ;;  %2639 = vrsqrt.f32 %v1872_v37  ;;  %v3786_v1 = vmul.f32 0.0078125, %v1689_v54  ;;  %vm1925_vm6 = vmor %vm1923_vm5, %vm1924_vm4  ;;  %vm1933_vm8 = vweird.f32 %v1872_v37 }
 0x385   : > { %v1916_v23 = vsel %vm1915_vm3, %v2636_v24, %v1912_v25  ;;  %v1919_v21 = vmul.f32 %v2638_v3, %v1918_v0 }
 0x386   : > { %v2079_v58 = vmul.f32 %v1916_v23, %v1851_v10  ;;  %v1816_v26 = vmul.f32 %v3786_v1, %v3786_v1 }
 0x387   : > { %v1920_v22 = vmul.f32 0.5, %v1919_v21 }
 0x388   : > { %v2099_v31 = vmul.f32 %v3737_v13, %v2079_v58  ;;  %v1835_v61 = vsub.f32 %v1797_v20, %v1816_v26 }
 0x389   : > { %v1921_v9 = vsub.f32 1.5, %v1920_v22  ;;  %v1854_v22 = vsub.f32 %v3632_v42, %v3786_v1 }
 0x38a   : > { %v2640_v39 = vpop.eup %2639  ;;  %v2119_v33 = vadd.f32 %v3748_v60, %v2099_v31  ;;  %v1873_v40 = vadd.f32 1e-05, %v1835_v61  ;;  %v1748_v18 = vpop.xlane.xlu0 %1747 }
 0x38b   : > { %v1928_v44 = vmul.f32 %v2640_v39, %v1872_v37  ;;  %v1691_v35 = vpop.xlane.xlu2 %1690  ;;  %v1922_v24 = vmul.f32 %v2638_v3, %v1921_v9  ;;  %v1798_v52 = vmul.f32 0.0078125, %v1748_v18  ;;  %vm1934_vm7 = vweird.f32 %v2640_v39 }
 0x38c   : > { %2138 = vst [vmem:[%s3763_s15 + $0x10] sm:$0xff] %v2119_v33  ;;  %v3793_v12 = vmul.f32 0.0078125, %v1691_v35  ;;  %2641 = vrsqrt.f32 %v1873_v40  ;;  %vm1935_vm9 = vmor %vm1933_vm8, %vm1934_vm7  ;;  %vm1943_vm11 = vweird.f32 %v1873_v40 }
 0x38d   : > { %v1929_v38 = vmul.f32 %v2640_v39, %v1928_v44  ;;  %v1926_v17 = vsel %vm1925_vm6, %v2638_v3, %v1922_v24 }
 0x38e   : > { %v1817_v57 = vmul.f32 %v3793_v12, %v3793_v12  ;;  %v2080_v50 = vmul.f32 %v1926_v17, %v1852_v62 }
 0x38f   : > { %v1930_v11 = vmul.f32 0.5, %v1929_v38 }
 0x390   : > { %v1836_v7 = vsub.f32 %v1798_v52, %v1817_v57  ;;  %v2100_v28 = vmul.f32 %v3737_v13, %v2080_v50  ;;  %v1855_v52 = vsub.f32 %v3639_v34, %v3793_v12 }
 0x391   : > { %v1931_v8 = vsub.f32 1.5, %v1930_v11 }
 0x392   : > { %v1874_v53 = vadd.f32 1e-05, %v1836_v7  ;;  %v2642_v49 = vpop.eup %2641  ;;  %v2120_v59 = vadd.f32 %v3748_v60, %v2100_v28  ;;  %v1693_v4 = vpop.xlane.xlu0 %1692 }
 0x393   : > { %v1932_v5 = vmul.f32 %v2640_v39, %v1931_v8  ;;  %v1750_v14 = vpop.xlane.xlu1 %1749  ;;  %v1938_v48 = vmul.f32 %v2642_v49, %v1873_v40  ;;  %v3804_v16 = vmul.f32 0.0078125, %v1693_v4  ;;  %vm1944_vm10 = vweird.f32 %v2642_v49 }
 0x394   : > { %2643 = vrsqrt.f32 %v1874_v53  ;;  %2139 = vst [vmem:[%s3763_s15 + $0x18] sm:$0xff] %v2120_v59  ;;  %v1799_v43 = vmul.f32 0.0078125, %v1750_v14  ;;  %vm1945_vm12 = vmor %vm1943_vm11, %vm1944_vm10  ;;  %vm1953_vm14 = vweird.f32 %v1874_v53 }
 0x395   : > { %v1936_v27 = vsel %vm1935_vm9, %v2640_v39, %v1932_v5  ;;  %v1939_v3 = vmul.f32 %v2642_v49, %v1938_v48  ;;  %v1818_v25 = vmul.f32 %v3804_v16, %v3804_v16 }
 0x396   : > { %v2081_v29 = vmul.f32 %v1936_v27, %v1853_v6 }
 0x397   : > { %v1940_v54 = vmul.f32 0.5, %v1939_v3  ;;  %v1837_v10 = vsub.f32 %v1799_v43, %v1818_v25 }
 0x398   : > { %v2101_v37 = vmul.f32 %v3737_v13, %v2081_v29  ;;  %v1856_v29 = vsub.f32 %v3646_v55, %v3804_v16 }
 0x399   : > { %v1941_v41 = vsub.f32 1.5, %v1940_v54  ;;  %v1875_v58 = vadd.f32 1e-05, %v1837_v10 }
 0x39a   : > { %v2644_v0 = vpop.eup %2643  ;;  %v2121_v51 = vadd.f32 %v3748_v60, %v2101_v37  ;;  %v1752_v21 = vpop.xlane.xlu2 %1751 }
 0x39b   : > { %v1948_v23 = vmul.f32 %v2644_v0, %v1874_v53  ;;  %v1695_v20 = vpop.xlane.xlu1 %1694  ;;  %v1942_v26 = vmul.f32 %v2642_v49, %v1941_v41  ;;  %2645 = vrsqrt.f32 %v1875_v58  ;;  %v1800_v33 = vmul.f32 0.0078125, %v1752_v21 }
 0x39c   : > { %2140 = vst [vmem:[%s3763_s15 + $0x20] sm:$0xff] %v2121_v51  ;;  %v3811_v31 = vmul.f32 0.0078125, %v1695_v20  ;;  %vm1954_vm13 = vweird.f32 %v2644_v0  ;;  %vm1963_vm1 = vweird.f32 %v1875_v58 }
 0x39d   : > { %v1949_v61 = vmul.f32 %v2644_v0, %v1948_v23  ;;  %v1946_v39 = vsel %vm1945_vm12, %v2642_v49, %v1942_v26  ;;  %vm1955_vm15 = vmor %vm1953_vm14, %vm1954_vm13 }
 0x39e   : > { %v1819_v9 = vmul.f32 %v3811_v31, %v3811_v31  ;;  %v2082_v44 = vmul.f32 %v1946_v39, %v1854_v22  ;;  %v1857_v20 = vsub.f32 %v3653_v30, %v3811_v31 }
 0x39f   : > { %v1950_v18 = vmul.f32 0.5, %v1949_v61 }
 0x3a0   : > { %v1838_v35 = vsub.f32 %v1800_v33, %v1819_v9  ;;  %v2102_v24 = vmul.f32 %v3737_v13, %v2082_v44 }
 0x3a1   : > { %v1951_v40 = vsub.f32 1.5, %v1950_v18  ;;  %v2646_v38 = vpop.eup %2645 }
 0x3a2   : > { %v1876_v62 = vadd.f32 1e-05, %v1838_v35  ;;  %v2122_v42 = vadd.f32 %v3748_v60, %v2102_v24  ;;  %v1697_v17 = vpop.xlane.xlu2 %1696  ;;  %v1958_v57 = vmul.f32 %v2646_v38, %v1875_v58  ;;  %v1754_v50 = vpop.xlane.xlu0 %1753  ;;  %vm1964_vm0 = vweird.f32 %v2646_v38 }
 0x3a3   : > { %v1952_v1 = vmul.f32 %v2644_v0, %v1951_v40  ;;  %v3822_v7 = vmul.f32 0.0078125, %v1697_v17  ;;  %v1801_v59 = vmul.f32 0.0078125, %v1754_v50  ;;  %vm1965_vm2 = vmor %vm1963_vm1, %vm1964_vm0 }
 0x3a4   : > { %2647 = vrsqrt.f32 %v1876_v62  ;;  %2141 = vst [vmem:[%s3763_s15 + $0x28] sm:$0xff] %v2122_v42  ;;  %v1959_v8 = vmul.f32 %v2646_v38, %v1958_v57  ;;  %vm1973_vm4 = vweird.f32 %v1876_v62 }
 0x3a5   : > { %v1956_v11 = vsel %vm1955_vm15, %v2644_v0, %v1952_v1  ;;  %v1820_v49 = vmul.f32 %v3822_v7, %v3822_v7  ;;  %v1858_v1 = vsub.f32 %v3660_v2, %v3822_v7 }
 0x3a6   : > { %v2083_v28 = vmul.f32 %v1956_v11, %v1855_v52  ;;  %v1960_v5 = vmul.f32 0.5, %v1959_v8 }
 0x3a7   : > { %v1839_v4 = vsub.f32 %v1801_v59, %v1820_v49 }
 0x3a8   : > { %v2103_v53 = vmul.f32 %v3737_v13, %v2083_v28  ;;  %v1961_v14 = vsub.f32 1.5, %v1960_v5 }
 0x3a9   : > { %v1877_v48 = vadd.f32 1e-05, %v1839_v4 }
 0x3aa   : > { %v2648_v34 = vpop.eup %2647  ;;  %v2123_v12 = vadd.f32 %v3748_v60, %v2103_v53  ;;  %v1962_v27 = vmul.f32 %v2646_v38, %v1961_v14 }
 0x3ab   : > { %v1968_v6 = vmul.f32 %v2648_v34, %v1876_v62  ;;  %2649 = vrsqrt.f32 %v1877_v48  ;;  %vm1974_vm3 = vweird.f32 %v2648_v34  ;;  %vm1983_vm7 = vweird.f32 %v1877_v48 }
 0x3ac   : > { %2142 = vst [vmem:[%s3763_s15 + $0x30] sm:$0xff] %v2123_v12  ;;  %v1966_v25 = vsel %vm1965_vm2, %v2646_v38, %v1962_v27  ;;  %vm1975_vm5 = vmor %vm1973_vm4, %vm1974_vm3 }
 0x3ad   : > { %v1969_v3 = vmul.f32 %v2648_v34, %v1968_v6  ;;  %v2084_v37 = vmul.f32 %v1966_v25, %v1856_v29 }
 0x3ae   : > { %v1699_v43 = vpop.xlane.xlu0 %1698 }
 0x3af   : > { %v1970_v54 = vmul.f32 0.5, %v1969_v3  ;;  %v3831_v10 = vmul.f32 0.0078125, %v1699_v43  ;;  %v2104_v51 = vmul.f32 %v3737_v13, %v2084_v37 }
 0x3b0   : > { %v1756_v0 = vpop.xlane.xlu1 %1755 }
 0x3b1   : > { %v1971_v41 = vsub.f32 1.5, %v1970_v54  ;;  %v1821_v23 = vmul.f32 %v3831_v10, %v3831_v10  ;;  %v1802_v58 = vmul.f32 0.0078125, %v1756_v0  ;;  %v2650_v55 = vpop.eup %2649  ;;  %v2124_v16 = vadd.f32 %v3748_v60, %v2104_v51 }
 0x3b2   : > { %v1978_v26 = vmul.f32 %v2650_v55, %v1877_v48  ;;  %vm1984_vm6 = vweird.f32 %v2650_v55  ;;  %v1859_v27 = vsub.f32 %v3667_v19, %v3831_v10 }
 0x3b3   : > { %v1972_v21 = vmul.f32 %v2648_v34, %v1971_v41  ;;  %v1840_v22 = vsub.f32 %v1802_v58, %v1821_v23  ;;  %2143 = vst [vmem:[%s3763_s15 + $0x38] sm:$0xff] %v2124_v16  ;;  %vm1985_vm8 = vmor %vm1983_vm7, %vm1984_vm6 }
 0x3b4   : > { %v1979_v33 = vmul.f32 %v2650_v55, %v1978_v26 }
 0x3b5   : > { %v1976_v61 = vsel %vm1975_vm5, %v2648_v34, %v1972_v21  ;;  %v1878_v9 = vadd.f32 1e-05, %v1840_v22 }
 0x3b6   : > { %v2085_v39 = vmul.f32 %v1976_v61, %v1857_v20  ;;  %v1980_v18 = vmul.f32 0.5, %v1979_v33 }
 0x3b7   : > { %2651 = vrsqrt.f32 %v1878_v9  ;;  %vm1993_vm10 = vweird.f32 %v1878_v9 }
 0x3b8   : > { %v2105_v44 = vmul.f32 %v3737_v13, %v2085_v39  ;;  %v1758_v35 = vpop.xlane.xlu2 %1757  ;;  %v1701_v24 = vpop.xlane.xlu1 %1700  ;;  %v1981_v30 = vsub.f32 1.5, %v1980_v18 }
 0x3b9   : > { %v3841_v40 = vmul.f32 0.0078125, %v1701_v24  ;;  %v1803_v31 = vmul.f32 0.0078125, %v1758_v35 }
 0x3ba   : > { %v2125_v62 = vadd.f32 %v3748_v60, %v2105_v44  ;;  %v1982_v42 = vmul.f32 %v2650_v55, %v1981_v30 }
 0x3bb   : > { %v1822_v38 = vmul.f32 %v3841_v40, %v3841_v40  ;;  %v1860_v39 = vsub.f32 %v3674_v46, %v3841_v40 }
 0x3bc   : > { %2144 = vst [vmem:[%s3763_s15 + $0x40] sm:$0xff] %v2125_v62  ;;  %v1986_v57 = vsel %vm1985_vm8, %v2650_v55, %v1982_v42 }
 0x3bd   : > { %v1841_v17 = vsub.f32 %v1803_v31, %v1822_v38  ;;  %v2652_v52 = vpop.eup %2651  ;;  %v2086_v50 = vmul.f32 %v1986_v57, %v1858_v1 }
 0x3be   : > { %v1988_v11 = vmul.f32 %v2652_v52, %v1878_v9  ;;  %vm1994_vm9 = vweird.f32 %v2652_v52 }
 0x3bf   : > { %v1879_v28 = vadd.f32 1e-05, %v1841_v17  ;;  %v2106_v59 = vmul.f32 %v3737_v13, %v2086_v50  ;;  %vm1995_vm11 = vmor %vm1993_vm10, %vm1994_vm9 }
 0x3c0   : > { %v1703_v8 = vpop.xlane.xlu2 %1702  ;;  %v1760_v49 = vpop.xlane.xlu0 %1759  ;;  %v1989_v53 = vmul.f32 %v2652_v52, %v1988_v11 }
 0x3c1   : > { %2653 = vrsqrt.f32 %v1879_v28  ;;  %v3850_v5 = vmul.f32 0.0078125, %v1703_v8  ;;  %v2126_v4 = vadd.f32 %v3748_v60, %v2106_v59  ;;  %v1804_v7 = vmul.f32 0.0078125, %v1760_v49 }
 0x3c2   : > { %v1990_v34 = vmul.f32 0.5, %v1989_v53  ;;  %vm2003_vm13 = vweird.f32 %v1879_v28 }
 0x3c3   : > { %v1823_v2 = vmul.f32 %v3850_v5, %v3850_v5  ;;  %2145 = vst [vmem:[%s3763_s15 + $0x48] sm:$0xff] %v2126_v4 }
 0x3c4   : > { %v1991_v12 = vsub.f32 1.5, %v1990_v34 }
 0x3c5   : > { %v1842_v14 = vsub.f32 %v1804_v7, %v1823_v2 }
 0x3c6   : > { %v1992_v48 = vmul.f32 %v2652_v52, %v1991_v12 }
 0x3c7   : > { %v2654_v6 = vpop.eup %2653  ;;  %v1880_v3 = vadd.f32 1e-05, %v1842_v14 }
 0x3c8   : > { %v1998_v29 = vmul.f32 %v2654_v6, %v1879_v28  ;;  %v1705_v25 = vpop.xlane.xlu0 %1704  ;;  %v1762_v43 = vpop.xlane.xlu1 %1761  ;;  %v1996_v37 = vsel %vm1995_vm11, %v2652_v52, %v1992_v48  ;;  %vm2004_vm12 = vweird.f32 %v2654_v6  ;;  %v1861_v28 = vsub.f32 %v3681_v32, %v3850_v5 }
 0x3c9   : > { %v3858_v54 = vmul.f32 0.0078125, %v1705_v25  ;;  %v2087_v0 = vmul.f32 %v1996_v37, %v1859_v27  ;;  %2655 = vrsqrt.f32 %v1880_v3  ;;  %v1805_v23 = vmul.f32 0.0078125, %v1762_v43  ;;  %vm2005_vm14 = vmor %vm2003_vm13, %vm2004_vm12 }
 0x3ca   : > { %v1999_v51 = vmul.f32 %v2654_v6, %v1998_v29  ;;  %vm2013_vm0 = vweird.f32 %v1880_v3 }
 0x3cb   : > { %v1824_v41 = vmul.f32 %v3858_v54, %v3858_v54  ;;  %v2107_v58 = vmul.f32 %v3737_v13, %v2087_v0  ;;  %v1862_v48 = vsub.f32 %v3688_v15, %v3858_v54 }
 0x3cc   : > { %v2000_v55 = vmul.f32 0.5, %v1999_v51 }
 0x3cd   : > { %v1843_v19 = vsub.f32 %v1805_v23, %v1824_v41  ;;  %v2127_v10 = vadd.f32 %v3748_v60, %v2107_v58 }
 0x3ce   : > { %v2001_v16 = vsub.f32 1.5, %v2000_v55 }
 0x3cf   : > { %v1881_v21 = vadd.f32 1e-05, %v1843_v19  ;;  %v2656_v20 = vpop.eup %2655  ;;  %2146 = vst [vmem:[%s3763_s15 + $0x50] sm:$0xff] %v2127_v10 }
 0x3d0   : > { %v2002_v26 = vmul.f32 %v2654_v6, %v2001_v16  ;;  %v1764_v22 = vpop.xlane.xlu2 %1763  ;;  %v1707_v61 = vpop.xlane.xlu1 %1706  ;;  %v2008_v33 = vmul.f32 %v2656_v20, %v1880_v3  ;;  %vm2014_vm15 = vweird.f32 %v2656_v20 }
 0x3d1   : > { %2657 = vrsqrt.f32 %v1881_v21  ;;  %v3867_v44 = vmul.f32 0.0078125, %v1707_v61  ;;  %v1806_v24 = vmul.f32 0.0078125, %v1764_v22  ;;  %vm2015_vm1 = vmor %vm2013_vm0, %vm2014_vm15  ;;  %vm2023_vm3 = vweird.f32 %v1881_v21 }
 0x3d2   : > { %v2006_v9 = vsel %vm2005_vm14, %v2654_v6, %v2002_v26  ;;  %v2009_v35 = vmul.f32 %v2656_v20, %v2008_v33 }
 0x3d3   : > { %v2088_v18 = vmul.f32 %v2006_v9, %v1860_v39  ;;  %v1825_v62 = vmul.f32 %v3867_v44, %v3867_v44  ;;  %v1863_v54 = vsub.f32 %v3695_v47, %v3867_v44 }
 0x3d4   : > { %v2010_v31 = vmul.f32 0.5, %v2009_v35 }
 0x3d5   : > { %v2108_v30 = vmul.f32 %v3737_v13, %v2088_v18  ;;  %v1844_v38 = vsub.f32 %v1806_v24, %v1825_v62 }
 0x3d6   : > { %v2011_v40 = vsub.f32 1.5, %v2010_v31 }
 0x3d7   : > { %v2658_v42 = vpop.eup %2657  ;;  %v2128_v46 = vadd.f32 %v3748_v60, %v2108_v30  ;;  %v1882_v17 = vadd.f32 1e-05, %v1844_v38 }
 0x3d8   : > { %v2018_v1 = vmul.f32 %v2658_v42, %v1881_v21  ;;  %v1709_v52 = vpop.xlane.xlu2 %1708  ;;  %v1766_v57 = vpop.xlane.xlu0 %1765  ;;  %v2012_v50 = vmul.f32 %v2656_v20, %v2011_v40  ;;  %vm2024_vm2 = vweird.f32 %v2658_v42 }
 0x3d9   : > { %2147 = vst [vmem:[%s3763_s15 + $0x58] sm:$0xff] %v2128_v46  ;;  %v3874_v11 = vmul.f32 0.0078125, %v1709_v52  ;;  %2659 = vrsqrt.f32 %v1882_v17  ;;  %v1807_v53 = vmul.f32 0.0078125, %v1766_v57  ;;  %vm2025_vm4 = vmor %vm2023_vm3, %vm2024_vm2  ;;  %vm2033_vm6 = vweird.f32 %v1882_v17 }
 0x3da   : > { %v2019_v8 = vmul.f32 %v2658_v42, %v2018_v1  ;;  %v2016_v49 = vsel %vm2015_vm1, %v2656_v20, %v2012_v50 }
 0x3db   : > { %v1826_v59 = vmul.f32 %v3874_v11, %v3874_v11  ;;  %v2089_v4 = vmul.f32 %v2016_v49, %v1861_v28  ;;  %v1864_v47 = vsub.f32 %v3706_v36, %v3874_v11 }
 0x3dc   : > { %v2020_v34 = vmul.f32 0.5, %v2019_v8 }
 0x3dd   : > { %v1845_v2 = vsub.f32 %v1807_v53, %v1826_v59  ;;  %v2109_v7 = vmul.f32 %v3737_v13, %v2089_v4 }
 0x3de   : > { %v2021_v12 = vsub.f32 1.5, %v2020_v34 }
 0x3df   : > { %v1883_v14 = vadd.f32 1e-05, %v1845_v2  ;;  %v2660_v6 = vpop.eup %2659  ;;  %v2129_v32 = vadd.f32 %v3748_v60, %v2109_v7 }
 0x3e0   : > { %v2022_v5 = vmul.f32 %v2658_v42, %v2021_v12  ;;  %v2028_v27 = vmul.f32 %v2660_v6, %v1882_v17  ;;  %vm2034_vm5 = vweird.f32 %v2660_v6  ;;  %v1711_v55 = vpop.xlane.xlu0 %1710 }
 0x3e1   : > { %2661 = vrsqrt.f32 %v1883_v14  ;;  %2148 = vst [vmem:[%s3763_s15 + $0x60] sm:$0xff] %v2129_v32  ;;  %vm2035_vm7 = vmor %vm2033_vm6, %vm2034_vm5  ;;  %v1789_v16 = vmul.f32 0.0078125, %v1711_v55  ;;  %vm2043_vm9 = vweird.f32 %v1883_v14 }
 0x3e2   : > { %v2026_v29 = vsel %vm2025_vm4, %v2658_v42, %v2022_v5  ;;  %v2029_v25 = vmul.f32 %v2660_v6, %v2028_v27 }
 0x3e3   : > { %v2090_v3 = vmul.f32 %v2026_v29, %v1862_v48  ;;  %v1827_v33 = vmul.f32 %v1789_v16, %v1789_v16  ;;  %v1865_v48 = vsub.f32 %v3719_v63, %v1789_v16 }
 0x3e4   : > { %v2030_v37 = vmul.f32 0.5, %v2029_v25 }
 0x3e5   : > { %v2110_v43 = vmul.f32 %v3737_v13, %v2090_v3 }
 0x3e6   : > { %v1713_v0 = vpop.xlane.xlu1 %1712  ;;  %v2031_v23 = vsub.f32 1.5, %v2030_v37 }
 0x3e7   : > { %v2662_v51 = vpop.eup %2661  ;;  %v2130_v41 = vadd.f32 %v3748_v60, %v2110_v43  ;;  %v1790_v46 = vmul.f32 0.0078125, %v1713_v0 }
 0x3e8   : > { %v2038_v58 = vmul.f32 %v2662_v51, %v1883_v14  ;;  %v2032_v15 = vmul.f32 %v2660_v6, %v2031_v23  ;;  %vm2044_vm8 = vweird.f32 %v2662_v51 }
 0x3e9   : > { %2149 = vst [vmem:[%s3763_s15 + $0x68] sm:$0xff] %v2130_v41  ;;  %vm2045_vm10 = vmor %vm2043_vm9, %vm2044_vm8  ;;  %v1828_v36 = vmul.f32 %v1790_v46, %v1790_v46 }
 0x3ea   : > { %v2039_v19 = vmul.f32 %v2662_v51, %v2038_v58  ;;  %v2036_v10 = vsel %vm2035_vm7, %v2660_v6, %v2032_v15 }
 0x3eb   : > { %v2091_v21 = vmul.f32 %v2036_v10, %v1863_v54 }
 0x3ec   : > { %v2040_v20 = vmul.f32 0.5, %v2039_v19 }
 0x3ed   : > { %v2111_v26 = vmul.f32 %v3737_v13, %v2091_v21 }
 0x3ee   : > { %v2041_v22 = vsub.f32 1.5, %v2040_v20  ;;  %v1715_v61 = vpop.xlane.xlu2 %1714  ;;  %v1768_v39 = vpop.xlane.xlu1 %1767 }
 0x3ef   : > { %v1791_v9 = vmul.f32 0.0078125, %v1715_v61  ;;  %v1808_v18 = vmul.f32 0.0078125, %v1768_v39  ;;  %v2131_v35 = vadd.f32 %v3748_v60, %v2111_v26 }
 0x3f0   : > { %v2042_v24 = vmul.f32 %v2662_v51, %v2041_v22  ;;  %v1772_v30 = vpop.xlane.xlu0 %1771 }
 0x3f1   : > { %v1829_v44 = vmul.f32 %v1791_v9, %v1791_v9  ;;  %v1846_v62 = vsub.f32 %v1808_v18, %v1827_v33  ;;  %2150 = vst [vmem:[%s3763_s15 + $0x70] sm:$0xff] %v2131_v35  ;;  %v1810_v38 = vmul.f32 0.0078125, %v1772_v30  ;;  %v1867_v37 = vsub.f32 %v3761_v45, %v1791_v9 }
 0x3f2   : > { %v2046_v31 = vsel %vm2045_vm10, %v2662_v51, %v2042_v24  ;;  %v1866_v45 = vsub.f32 %v3730_v56, %v1790_v46 }
 0x3f3   : > { %v2092_v42 = vmul.f32 %v2046_v31, %v1864_v47  ;;  %v1884_v40 = vadd.f32 1e-05, %v1846_v62  ;;  %v1848_v1 = vsub.f32 %v1810_v38, %v1829_v44 }
 0x3f5   : > { %v2112_v17 = vmul.f32 %v3737_v13, %v2092_v42  ;;  %2663 = vrsqrt.f32 %v1884_v40  ;;  %v1886_v52 = vadd.f32 1e-05, %v1848_v1  ;;  %vm2053_vm12 = vweird.f32 %v1884_v40 }
 0x3f6   : > { %v1770_v57 = vpop.xlane.xlu2 %1769 }
 0x3f7   : > { %v2132_v50 = vadd.f32 %v3748_v60, %v2112_v17  ;;  %v1809_v11 = vmul.f32 0.0078125, %v1770_v57  ;;  %2665 = vrsqrt.f32 %v1886_v52  ;;  %vm2073_vm15 = vweird.f32 %v1886_v52 }
 0x3f9   : > { %2151 = vst [vmem:[%s3763_s15 + $0x78] sm:$0xff] %v2132_v50  ;;  %v1847_v28 = vsub.f32 %v1809_v11, %v1828_v36 }
 0x3fb   : > { %v2664_v8 = vpop.eup %2663  ;;  %v1885_v49 = vadd.f32 1e-05, %v1847_v28 }
 0x3fc   : > { %v2048_v59 = vmul.f32 %v2664_v8, %v1884_v40  ;;  %vm2054_vm11 = vweird.f32 %v2664_v8 }
 0x3fd   : > { %2667 = vrsqrt.f32 %v1885_v49  ;;  %v2666_v53 = vpop.eup %2665  ;;  %vm2055_vm13 = vmor %vm2053_vm12, %vm2054_vm11  ;;  %vm2063_vm2 = vweird.f32 %v1885_v49 }
 0x3fe   : > { %v2049_v4 = vmul.f32 %v2664_v8, %v2048_v59  ;;  %v2068_v34 = vmul.f32 %v2666_v53, %v1886_v52  ;;  %vm2074_vm14 = vweird.f32 %v2666_v53 }
 0x3ff   : > { %vm2075_vm0 = vmor %vm2073_vm15, %vm2074_vm14 }
 0x400   : > { %v2050_v2 = vmul.f32 0.5, %v2049_v4  ;;  %v2069_v7 = vmul.f32 %v2666_v53, %v2068_v34 }
 0x402   : > { %v2051_v12 = vsub.f32 1.5, %v2050_v2  ;;  %v2070_v6 = vmul.f32 0.5, %v2069_v7 }
 0x403   : > { %v2668_v14 = vpop.eup %2667 }
 0x404   : > { %v2052_v32 = vmul.f32 %v2664_v8, %v2051_v12  ;;  %v2058_v5 = vmul.f32 %v2668_v14, %v1885_v49  ;;  %v2071_v27 = vsub.f32 1.5, %v2070_v6  ;;  %vm2064_vm1 = vweird.f32 %v2668_v14 }
 0x405   : > { %vm2065_vm3 = vmor %vm2063_vm2, %vm2064_vm1 }
 0x406   : > { %v2056_v29 = vsel %vm2055_vm13, %v2664_v8, %v2052_v32  ;;  %v2059_v3 = vmul.f32 %v2668_v14, %v2058_v5  ;;  %v2072_v43 = vmul.f32 %v2666_v53, %v2071_v27 }
 0x407   : > { %v2093_v25 = vmul.f32 %v2056_v29, %v1865_v48 }
 0x408   : > { %v2060_v0 = vmul.f32 0.5, %v2059_v3  ;;  %v2076_v41 = vsel %vm2075_vm0, %v2666_v53, %v2072_v43 }
 0x409   : > { %v2113_v51 = vmul.f32 %v3737_v13, %v2093_v25  ;;  %v2095_v23 = vmul.f32 %v2076_v41, %v1867_v37 }
 0x40a   : > { %v2061_v63 = vsub.f32 1.5, %v2060_v0 }
 0x40b   : > { %v2133_v58 = vadd.f32 %v3748_v60, %v2113_v51  ;;  %v2115_v55 = vmul.f32 %v3737_v13, %v2095_v23 }
 0x40c   : > { %v2062_v15 = vmul.f32 %v2668_v14, %v2061_v63 }
 0x40d   : > { %2152 = vst [vmem:[%s3763_s15 + $0x80] sm:$0xff] %v2133_v58  ;;  %v2135_v54 = vadd.f32 %v3748_v60, %v2115_v55 }
 0x40e   : > { %v2066_v19 = vsel %vm2065_vm3, %v2668_v14, %v2062_v15 }
 0x40f   : > { %v2094_v10 = vmul.f32 %v2066_v19, %v1866_v45  ;;  %2154 = vst [vmem:[%s3763_s15 + $0x90] sm:$0xff] %v2135_v54 }
 0x411   : > { %v2114_v16 = vmul.f32 %v3737_v13, %v2094_v10 }
 0x413   : > { %v2134_v21 = vadd.f32 %v3748_v60, %v2114_v16 }
 0x415   : > { %2153 = vst [vmem:[%s3763_s15 + $0x88] sm:$0xff] %v2134_v21 }
 0x416   : > { %2726 = shalt.err (!%p2723_p8)
}
 0x417   : > { %s2770_s23 = smov 128   ;;  %s2771_s15 = smov 8  }
 0x418   : > { %2498 = dma.vmem_to_hbm [thread:$0]  (%p2850_p5), %s2169_s19, 2432, %s2171_s20, %s2156_s21, %s2770_s23, %s2770_s23, %s2771_s15  }
 0x419 PF: > { %p2510_p9 = scmp.ge.s32.totalorder %s2765_s27, 2  ;;  %s2185_s17 = sand.u32 1, %s2753_s24  }
 0x41a   : > { %s2186_s18 = scalar_lea.sflag [#allocation4], %s2185_s17 }
 0x41b   : > { %p2505_p10 = pnand %p2510_p9, %p2854_p6 }
 0x41d   : > { %p2506_p11 = pneg %p2505_p10 }
 0x41f   : > { %2748 = dma.done.wait (%p2506_p11), %s2186_s18, 2432  }
 0x420   : > { %2750 = vsyncadd (%p2506_p11), %s2186_s18, 4294964864  ;;  %p18_p12 = scmp.ge.s32.totalorder %s2837_s30, 4   ;;  %s3958_s24 = smov %s2757_s25 }
 0x421   : > { %s3959_s25 = smov %s2761_s26  ;;  %s3960_s26 = smov %s2848_s10 }
 0x422   : > { %s3961_s27 = smov %s2837_s30  ;;  %20 = sbr.rel (!%p18_p12) target bundleno = 4 (0x4), region = 88 }
 0x427   :  { %2192 = vsyncpa [#allocation3], 1 }
 0x428   :  { %2194 = vsyncpa [#allocation3 + $0x1], 1 }
 0x429   :  { %2195 = vsyncpa [#allocation4], 1 }
 0x42a   :  { %2197 = vsyncpa [#allocation4 + $0x1], 1 }

</bundles_post_ra>
